<compile_context>
chip_gen: v7x
topology: tpu7x:2x2x1
jax: 0.10.0
libtpu: 0.0.40
codegen_flags: <defaults>
</compile_context>

<pallas_src>
import math

import jax
import jax.numpy as jnp
import numpy as np
from jax import lax
from jax.experimental import pallas as pl
from jax.experimental.pallas import tpu as pltpu

# ----------------------------- config ------------------------------------
B = 2                 # batch
S = 8                 # sequence length (q_len == kv_seq_len, no KV cache)
HIDDEN = 256          # hidden_size
NUM_HEADS = 4         # num_attention_heads
NUM_KV_HEADS = 2      # num_key_value_heads (GQA)
HEAD_DIM = HIDDEN // NUM_HEADS              # 64
KV_GROUPS = NUM_HEADS // NUM_KV_HEADS       # 2
ROPE_THETA = 10000.0
N_BIAS = 1.0          # config.n_bias  (softermax denominator bias)
N_CLIP = 0.0          # config.n_clip
# attention_dropout = 0.0 (eval) -> dropout is a no-op (not emitted).
# pretraining_tp == 1 and past_key_value is None -> those branches not taken.

QK_WIDTH = (NUM_HEADS + NUM_KV_HEADS) * HEAD_DIM   # 384 (q+k columns)
V_WIDTH = NUM_KV_HEADS * HEAD_DIM                  # 128 (v columns)
PACK_WIDTH = 2 * QK_WIDTH + V_WIDTH                # 896 = 7*128 (lane-dense)


# --------------------------- fused Pallas kernel ---------------------------
def make_fused_kernel(batch, seq, n_bias, n_clip):
    nq = NUM_HEADS * HEAD_DIM  # 256

    def kernel(x_ref, wqkv_ref, wo_ref, cos_ref, sin_ref, o_ref):
        f32, bf16 = jnp.float32, jnp.bfloat16

        # ---- fused QKV (+ rotate_half copies) projection: ONE 2-D MXU matmul ----
        x = x_ref[...].astype(bf16)                               # (B*S, H)
        qkv = jnp.dot(x, wqkv_ref[...],
                      preferred_element_type=f32)                 # (B*S, 896)

        qk = qkv[:, :QK_WIDTH]                                    # (B*S, 384)
        qk_sw = qkv[:, QK_WIDTH:2 * QK_WIDTH]                     # half-swapped q|k
        v_flat = qkv[:, 2 * QK_WIDTH:]                            # (B*S, 128)

        # ---- RoPE (f32 VPU); rotate_half sign folded into sin table -------------
        qk_rot = qk * cos_ref[...] + qk_sw * sin_ref[...]         # (B*S, 384)
        q_flat = qk_rot[:, :nq]          # (B*S, 256), 1/sqrt(Dh) already folded in
        k_flat = qk_rot[:, nq:]          # (B*S, 128)

        # ---- regroup into (B*NKV, G*S, Dh) / (B*NKV, S, Dh): GQA w/o KV repeat ---
        q_tiles, k_tiles, v_tiles = [], [], []
        for b in range(batch):
            rs = slice(b * seq, (b + 1) * seq)
            for kv in range(NUM_KV_HEADS):
                q_parts = [
                    q_flat[rs, (kv * KV_GROUPS + r) * HEAD_DIM:
                               (kv * KV_GROUPS + r + 1) * HEAD_DIM]
                    for r in range(KV_GROUPS)]
                q_tiles.append(jnp.concatenate(q_parts, axis=0))          # (G*S, Dh)
                k_tiles.append(k_flat[rs, kv * HEAD_DIM:(kv + 1) * HEAD_DIM])
                v_tiles.append(v_flat[rs, kv * HEAD_DIM:(kv + 1) * HEAD_DIM])
        q_att = jnp.stack(q_tiles).astype(bf16)    # (B*NKV, G*S, Dh) = (4,16,64)
        k_att = jnp.stack(k_tiles).astype(bf16)    # (B*NKV,   S, Dh) = (4, 8,64)
        v_att = jnp.stack(v_tiles).astype(bf16)    # (B*NKV,   S, Dh)

        # ---- scores + in-kernel causal mask (tiled along the G*S row axis) ------
        scores = lax.dot_general(                                   # (4, 16, 8) f32
            q_att, k_att,
            dimension_numbers=(((2,), (2,)), ((0,), (0,))),
            preferred_element_type=f32)
        row = lax.broadcasted_iota(jnp.int32, (seq, seq), 0)
        col = lax.broadcasted_iota(jnp.int32, (seq, seq), 1)
        causal = jnp.where(row >= col, 0.0, -1e9).astype(f32)       # (S, S)
        causal = jnp.tile(causal, (KV_GROUPS, 1))                   # (G*S, S)
        scores = scores + causal[None]

        # ---- softermax: exp(x-m) / (n_bias*exp(-m) + sum_j exp(x_j-m)) ----------
        m = jnp.max(scores, axis=-1, keepdims=True)
        p = jnp.exp(scores - m)
        denom = jnp.sum(p, axis=-1, keepdims=True) + n_bias * jnp.exp(-m)
        attn = p * pl.reciprocal(denom, approx=True)
        if n_clip != 0.0:
            # TODO(synk): exact clip_logits semantics unverified; identity at 0.
            attn = jnp.clip(attn * (1.0 + 2.0 * n_clip) - n_clip, 0.0, 1.0)

        # ---- PV (batched over B*NKV) ---------------------------------------------
        ctx = lax.dot_general(                                      # (4, 16, 64) f32
            attn.astype(bf16), v_att,
            dimension_numbers=(((2,), (1,)), ((0,), (0,))),
            preferred_element_type=f32)

        # ---- reassemble (B*S, NUM_HEADS*Dh) and single output-proj matmul --------
        out_rows = []
        for b in range(batch):
            cols = []
            for kv in range(NUM_KV_HEADS):
                for r in range(KV_GROUPS):
                    cols.append(ctx[b * NUM_KV_HEADS + kv,
                                    r * seq:(r + 1) * seq, :])      # (S, Dh)
            out_rows.append(jnp.concatenate(cols, axis=-1))          # (S, 256)
        ctx_flat = jnp.concatenate(out_rows, axis=0)                 # (B*S, 256)

        out = jnp.dot(ctx_flat.astype(bf16), wo_ref[...],
                      preferred_element_type=f32)                    # (B*S, H)
        o_ref[...] = out.astype(o_ref.dtype)                         # lane-dense store

    return kernel


# ------------------------------- glue --------------------------------------
def rope_cos_sin(position_ids):
    inv_freq = 1.0 / (ROPE_THETA ** (
        jnp.arange(0, HEAD_DIM, 2, dtype=jnp.float32) / HEAD_DIM))
    freqs = position_ids.astype(jnp.float32)[:, None] * inv_freq[None, :]  # (S, Dh/2)
    emb = jnp.concatenate([freqs, freqs], axis=-1)                         # (S, Dh)
    return jnp.cos(emb), jnp.sin(emb)


def rope_tables(position_ids, batch):
    # Tables laid out to match the packed qk column order: 6 head blocks of 64.
    # TODO(synk): position_ids is shared across the batch (same as the reference);
    # per-batch positions would need a (B, S) table build here.
    cos, sin = rope_cos_sin(position_ids)
    half = HEAD_DIM // 2
    sin_signed = jnp.concatenate([-sin[:, :half], sin[:, half:]], axis=-1)
    reps = NUM_HEADS + NUM_KV_HEADS
    cos_qk = jnp.tile(jnp.tile(cos, (1, reps)), (batch, 1))        # (B*S, 384)
    sin_qk = jnp.tile(jnp.tile(sin_signed, (1, reps)), (batch, 1))
    return cos_qk.astype(jnp.float32), sin_qk.astype(jnp.float32)


def pack_params(params):
    # Packed QKV weight: columns = [q | k | q_halfswap | k_halfswap | v] = 896.
    # 1/sqrt(head_dim) is folded into the q (and q_halfswap) columns; the
    # rotate_half half-swap permutation is baked in as extra output columns.
    scale = 1.0 / math.sqrt(HEAD_DIM)
    q_w = params["q_w"] * scale                       # (256, 256)  [out, in]
    k_w = params["k_w"]                               # (128, 256)
    v_w = params["v_w"]                               # (128, 256)

    def swap_halves(w, n_heads):
        w = w.reshape(n_heads, 2, HEAD_DIM // 2, HIDDEN)
        return w[:, ::-1].reshape(n_heads * HEAD_DIM, HIDDEN)

    q_sw = swap_halves(q_w, NUM_HEADS)
    k_sw = swap_halves(k_w, NUM_KV_HEADS)
    wqkv = jnp.concatenate([q_w, k_w, q_sw, k_sw, v_w], axis=0)   # (896, 256)
    wqkv = jnp.asarray(wqkv).T.astype(jnp.bfloat16)               # (256, 896)
    wo = params["o_w"].T.astype(jnp.bfloat16)                     # (256, 256)
    return wqkv, wo


def softerllama_attention_forward(params, hidden_states, position_ids):
    # TODO(synk): external (padding) attention_mask and the KV-cache path are not
    # plumbed into the fused kernel; the causal mask is generated in-kernel
    # (module has is_causal=True).
    # TODO(synk): n_bias / n_clip are baked as trace-time constants; if
    # learn_softmax updates them, the kernel must be retraced (or switch back to
    # SMEM scalar inputs).
    B_, S_, H_ = hidden_states.shape
    wqkv, wo = pack_params(params)
    cos_qk, sin_qk = rope_tables(position_ids, B_)
    x_flat = hidden_states.reshape(B_ * S_, H_)

    kernel = make_fused_kernel(B_, S_, float(params["n_bias"]),
                               float(params["n_clip"]))

    out_flat = pl.pallas_call(
        kernel,
        out_shape=jax.ShapeDtypeStruct((B_ * S_, H_), hidden_states.dtype),
        grid_spec=pltpu.PrefetchScalarGridSpec(
            num_scalar_prefetch=0,
            grid=(1,),                                     # single pipeline step
            in_specs=[
                pl.BlockSpec((B_ * S_, H_), lambda i: (0, 0)),                 # x
                pl.BlockSpec((H_, PACK_WIDTH), lambda i: (0, 0)),              # Wqkv+swap
                pl.BlockSpec((NUM_HEADS * HEAD_DIM, H_), lambda i: (0, 0)),    # Wo
                pl.BlockSpec((B_ * S_, QK_WIDTH), lambda i: (0, 0)),           # cos table
                pl.BlockSpec((B_ * S_, QK_WIDTH), lambda i: (0, 0)),           # signed sin
            ],
            out_specs=pl.BlockSpec((B_ * S_, H_), lambda i: (0, 0)),
        ),
        compiler_params=pltpu.CompilerParams(
            dimension_semantics=("arbitrary",)),
    )(x_flat, wqkv, wo, cos_qk, sin_qk)
    return out_flat.reshape(B_, S_, H_)


# -------------------------- pure-JAX reference -----------------------------
def reference_forward(params, hidden_states, position_ids):
    hp = lax.Precision.HIGHEST
    B_, S_, H_ = hidden_states.shape
    q = jnp.einsum("bsh,oh->bso", hidden_states, params["q_w"], precision=hp)
    k = jnp.einsum("bsh,oh->bso", hidden_states, params["k_w"], precision=hp)
    v = jnp.einsum("bsh,oh->bso", hidden_states, params["v_w"], precision=hp)
    q = q.reshape(B_, S_, NUM_HEADS, HEAD_DIM).transpose(0, 2, 1, 3)
    k = k.reshape(B_, S_, NUM_KV_HEADS, HEAD_DIM).transpose(0, 2, 1, 3)
    v = v.reshape(B_, S_, NUM_KV_HEADS, HEAD_DIM).transpose(0, 2, 1, 3)
    cos, sin = rope_cos_sin(position_ids)

    def rot_half(x):
        x1, x2 = jnp.split(x, 2, axis=-1)
        return jnp.concatenate([-x2, x1], axis=-1)

    q = q * cos + rot_half(q) * sin
    k = k * cos + rot_half(k) * sin
    k = jnp.repeat(k, KV_GROUPS, axis=1)
    v = jnp.repeat(v, KV_GROUPS, axis=1)

    scores = jnp.einsum("bhqd,bhkd->bhqk", q, k, precision=hp) / math.sqrt(HEAD_DIM)
    causal = jnp.where(jnp.tril(jnp.ones((S_, S_), jnp.bool_)), 0.0, -1e9)
    scores = scores + causal[None, None]
    m = jnp.max(scores, axis=-1, keepdims=True)
    p = jnp.exp(scores - m)
    attn = p / (jnp.sum(p, axis=-1, keepdims=True) + params["n_bias"] * jnp.exp(-m))
    attn = jnp.clip(attn * (1.0 + 2.0 * params["n_clip"]) - params["n_clip"], 0.0, 1.0)
    out = jnp.einsum("bhqk,bhkd->bhqd", attn, v, precision=hp)
    out = out.transpose(0, 2, 1, 3).reshape(B_, S_, HIDDEN)
    return jnp.einsum("bsi,hi->bsh", out, params["o_w"], precision=hp)


# -------------------------------- main -------------------------------------
if __name__ == "__main__":
    key = jax.random.PRNGKey(0)
    ks = jax.random.split(key, 5)
    params = {
        "q_w": 0.02 * jax.random.normal(ks[0], (NUM_HEADS * HEAD_DIM, HIDDEN), jnp.float32),
        "k_w": 0.02 * jax.random.normal(ks[1], (NUM_KV_HEADS * HEAD_DIM, HIDDEN), jnp.float32),
        "v_w": 0.02 * jax.random.normal(ks[2], (NUM_KV_HEADS * HEAD_DIM, HIDDEN), jnp.float32),
        "o_w": 0.02 * jax.random.normal(ks[3], (HIDDEN, NUM_HEADS * HEAD_DIM), jnp.float32),
        "n_bias": N_BIAS,
        "n_clip": N_CLIP,
    }
    x = jax.random.normal(ks[4], (B, S, HIDDEN), jnp.float32)
    position_ids = jnp.arange(S, dtype=jnp.int32)

    out = softerllama_attention_forward(params, x, position_ids)
    out = jax.block_until_ready(out)

    ref = reference_forward(params, x, position_ids)
    np.testing.assert_allclose(np.asarray(out), np.asarray(ref), atol=2e-2, rtol=2e-2)
    print("KERNEL_OK")
</pallas_src>

<mosaic_0001>
module attributes {stable_mosaic.version = 11 : i64} {
  func.func @kernel(%arg0: i32, %arg1: memref<16x256xf32, #tpu.memory_space<vmem>>, %arg2: memref<256x896xbf16, #tpu.memory_space<vmem>>, %arg3: memref<256x256xbf16, #tpu.memory_space<vmem>>, %arg4: memref<16x384xf32, #tpu.memory_space<vmem>>, %arg5: memref<16x384xf32, #tpu.memory_space<vmem>>, %arg6: memref<16x256xf32, #tpu.memory_space<vmem>>) attributes {dimension_semantics = [#tpu.dimension_semantics<arbitrary>], iteration_bounds = array<i64: 1>, scalar_prefetch = 0 : i64, scratch_operands = 0 : i64, tpu.core_type = #tpu.core_type<tc>, window_params = [{pipeline_mode = #tpu.pipeline_mode<synchronous>, transform_indices = @transform_0, window_bounds = array<i64: 16, 256>}, {pipeline_mode = #tpu.pipeline_mode<synchronous>, transform_indices = @transform_1, window_bounds = array<i64: 256, 896>}, {pipeline_mode = #tpu.pipeline_mode<synchronous>, transform_indices = @transform_2, window_bounds = array<i64: 256, 256>}, {pipeline_mode = #tpu.pipeline_mode<synchronous>, transform_indices = @transform_3, window_bounds = array<i64: 16, 384>}, {pipeline_mode = #tpu.pipeline_mode<synchronous>, transform_indices = @transform_4, window_bounds = array<i64: 16, 384>}, {pipeline_mode = #tpu.pipeline_mode<synchronous>, transform_indices = @transform_5, window_bounds = array<i64: 16, 256>}]} {
    %c0 = arith.constant 0 : index
    %c0_0 = arith.constant 0 : index
    %0 = vector.load %arg1[%c0, %c0_0] : memref<16x256xf32, #tpu.memory_space<vmem>>, vector<16x256xf32>
    %1 = arith.truncf %0 : vector<16x256xf32> to vector<16x256xbf16>
    %c0_1 = arith.constant 0 : index
    %c0_2 = arith.constant 0 : index
    %2 = vector.load %arg2[%c0_1, %c0_2] : memref<256x896xbf16, #tpu.memory_space<vmem>>, vector<256x896xbf16>
    %cst = arith.constant dense<0.000000e+00> : vector<16x896xf32>
    %3 = tpu.matmul %1, %2, %cst {dimension_numbers = #tpu.dot_dimension_numbers<[1], [0], [0], [1], [0, 0, 1, 1], [], []>} : vector<16x256xbf16>, vector<256x896xbf16>, vector<16x896xf32> -> vector<16x896xf32>
    %4 = vector.extract_strided_slice %3 {offsets = [0, 0], sizes = [16, 384], strides = [1, 1]} : vector<16x896xf32> to vector<16x384xf32>
    %5 = vector.extract_strided_slice %3 {offsets = [0, 384], sizes = [16, 384], strides = [1, 1]} : vector<16x896xf32> to vector<16x384xf32>
    %6 = vector.extract_strided_slice %3 {offsets = [0, 768], sizes = [16, 128], strides = [1, 1]} : vector<16x896xf32> to vector<16x128xf32>
    %c0_3 = arith.constant 0 : index
    %c0_4 = arith.constant 0 : index
    %7 = vector.load %arg4[%c0_3, %c0_4] : memref<16x384xf32, #tpu.memory_space<vmem>>, vector<16x384xf32>
    %8 = arith.mulf %4, %7 : vector<16x384xf32>
    %c0_5 = arith.constant 0 : index
    %c0_6 = arith.constant 0 : index
    %9 = vector.load %arg5[%c0_5, %c0_6] : memref<16x384xf32, #tpu.memory_space<vmem>>, vector<16x384xf32>
    %10 = arith.mulf %5, %9 : vector<16x384xf32>
    %11 = arith.addf %8, %10 : vector<16x384xf32>
    %12 = vector.extract_strided_slice %11 {offsets = [0, 0], sizes = [16, 256], strides = [1, 1]} : vector<16x384xf32> to vector<16x256xf32>
    %13 = vector.extract_strided_slice %11 {offsets = [0, 256], sizes = [16, 128], strides = [1, 1]} : vector<16x384xf32> to vector<16x128xf32>
    %14 = vector.extract_strided_slice %12 {offsets = [0, 0], sizes = [8, 64], strides = [1, 1]} : vector<16x256xf32> to vector<8x64xf32>
    %15 = vector.extract_strided_slice %12 {offsets = [0, 64], sizes = [8, 64], strides = [1, 1]} : vector<16x256xf32> to vector<8x64xf32>
    %16 = tpu.concatenate %14, %15 in 0 : vector<8x64xf32>, vector<8x64xf32> -> vector<16x64xf32>
    %17 = vector.extract_strided_slice %13 {offsets = [0, 0], sizes = [8, 64], strides = [1, 1]} : vector<16x128xf32> to vector<8x64xf32>
    %18 = vector.extract_strided_slice %6 {offsets = [0, 0], sizes = [8, 64], strides = [1, 1]} : vector<16x128xf32> to vector<8x64xf32>
    %19 = vector.extract_strided_slice %12 {offsets = [0, 128], sizes = [8, 64], strides = [1, 1]} : vector<16x256xf32> to vector<8x64xf32>
    %20 = vector.extract_strided_slice %12 {offsets = [0, 192], sizes = [8, 64], strides = [1, 1]} : vector<16x256xf32> to vector<8x64xf32>
    %21 = tpu.concatenate %19, %20 in 0 : vector<8x64xf32>, vector<8x64xf32> -> vector<16x64xf32>
    %22 = vector.extract_strided_slice %13 {offsets = [0, 64], sizes = [8, 64], strides = [1, 1]} : vector<16x128xf32> to vector<8x64xf32>
    %23 = vector.extract_strided_slice %6 {offsets = [0, 64], sizes = [8, 64], strides = [1, 1]} : vector<16x128xf32> to vector<8x64xf32>
    %24 = vector.extract_strided_slice %12 {offsets = [8, 0], sizes = [8, 64], strides = [1, 1]} : vector<16x256xf32> to vector<8x64xf32>
    %25 = vector.extract_strided_slice %12 {offsets = [8, 64], sizes = [8, 64], strides = [1, 1]} : vector<16x256xf32> to vector<8x64xf32>
    %26 = tpu.concatenate %24, %25 in 0 : vector<8x64xf32>, vector<8x64xf32> -> vector<16x64xf32>
    %27 = vector.extract_strided_slice %13 {offsets = [8, 0], sizes = [8, 64], strides = [1, 1]} : vector<16x128xf32> to vector<8x64xf32>
    %28 = vector.extract_strided_slice %6 {offsets = [8, 0], sizes = [8, 64], strides = [1, 1]} : vector<16x128xf32> to vector<8x64xf32>
    %29 = vector.extract_strided_slice %12 {offsets = [8, 128], sizes = [8, 64], strides = [1, 1]} : vector<16x256xf32> to vector<8x64xf32>
    %30 = vector.extract_strided_slice %12 {offsets = [8, 192], sizes = [8, 64], strides = [1, 1]} : vector<16x256xf32> to vector<8x64xf32>
    %31 = tpu.concatenate %29, %30 in 0 : vector<8x64xf32>, vector<8x64xf32> -> vector<16x64xf32>
    %32 = vector.extract_strided_slice %13 {offsets = [8, 64], sizes = [8, 64], strides = [1, 1]} : vector<16x128xf32> to vector<8x64xf32>
    %33 = vector.extract_strided_slice %6 {offsets = [8, 64], sizes = [8, 64], strides = [1, 1]} : vector<16x128xf32> to vector<8x64xf32>
    %34 = vector.shape_cast %16 : vector<16x64xf32> to vector<1x16x64xf32>
    %35 = vector.shape_cast %21 : vector<16x64xf32> to vector<1x16x64xf32>
    %36 = vector.shape_cast %26 : vector<16x64xf32> to vector<1x16x64xf32>
    %37 = vector.shape_cast %31 : vector<16x64xf32> to vector<1x16x64xf32>
    %38 = tpu.concatenate %34, %35, %36, %37 in 0 : vector<1x16x64xf32>, vector<1x16x64xf32>, vector<1x16x64xf32>, vector<1x16x64xf32> -> vector<4x16x64xf32>
    %39 = arith.truncf %38 : vector<4x16x64xf32> to vector<4x16x64xbf16>
    %40 = vector.shape_cast %17 : vector<8x64xf32> to vector<1x8x64xf32>
    %41 = vector.shape_cast %22 : vector<8x64xf32> to vector<1x8x64xf32>
    %42 = vector.shape_cast %27 : vector<8x64xf32> to vector<1x8x64xf32>
    %43 = vector.shape_cast %32 : vector<8x64xf32> to vector<1x8x64xf32>
    %44 = tpu.concatenate %40, %41, %42, %43 in 0 : vector<1x8x64xf32>, vector<1x8x64xf32>, vector<1x8x64xf32>, vector<1x8x64xf32> -> vector<4x8x64xf32>
    %45 = arith.truncf %44 : vector<4x8x64xf32> to vector<4x8x64xbf16>
    %46 = vector.shape_cast %18 : vector<8x64xf32> to vector<1x8x64xf32>
    %47 = vector.shape_cast %23 : vector<8x64xf32> to vector<1x8x64xf32>
    %48 = vector.shape_cast %28 : vector<8x64xf32> to vector<1x8x64xf32>
    %49 = vector.shape_cast %33 : vector<8x64xf32> to vector<1x8x64xf32>
    %50 = tpu.concatenate %46, %47, %48, %49 in 0 : vector<1x8x64xf32>, vector<1x8x64xf32>, vector<1x8x64xf32>, vector<1x8x64xf32> -> vector<4x8x64xf32>
    %51 = arith.truncf %50 : vector<4x8x64xf32> to vector<4x8x64xbf16>
    %cst_7 = arith.constant dense<0.000000e+00> : vector<4x16x8xf32>
    %52 = tpu.matmul %39, %45, %cst_7 {dimension_numbers = #tpu.dot_dimension_numbers<[2], [2], [1], [1], [0, 0, 0, 1, 1, 1], [0], [0]>} : vector<4x16x64xbf16>, vector<4x8x64xbf16>, vector<4x16x8xf32> -> vector<4x16x8xf32>
    %53 = tpu.iota {dimensions = array<i32: 0>} : vector<8x8xi32>
    %54 = tpu.iota {dimensions = array<i32: 1>} : vector<8x8xi32>
    %55 = arith.cmpi sge, %53, %54 : vector<8x8xi32>
    %cst_8 = arith.constant 0.000000e+00 : f32
    %cst_9 = arith.constant -1.000000e+09 : f32
    %56 = vector.broadcast %cst_8 : f32 to vector<8x8xf32>
    %57 = vector.broadcast %cst_9 : f32 to vector<8x8xf32>
    %58 = arith.select %55, %56, %57 : vector<8x8xi1>, vector<8x8xf32>
    %59 = tpu.concatenate %58, %58 in 0 : vector<8x8xf32>, vector<8x8xf32> -> vector<16x8xf32>
    %60 = vector.shape_cast %59 : vector<16x8xf32> to vector<1x16x8xf32>
    %61 = vector.broadcast %60 : vector<1x16x8xf32> to vector<4x16x8xf32>
    %62 = arith.addf %52, %61 : vector<4x16x8xf32>
    %cst_10 = arith.constant dense<0xFF800000> : vector<4x16xf32>
    %63 = vector.multi_reduction <maximumf>, %62, %cst_10 [2] : vector<4x16x8xf32> to vector<4x16xf32>
    %64 = vector.shape_cast %63 : vector<4x16xf32> to vector<4x16x1xf32>
    %65 = vector.broadcast %64 : vector<4x16x1xf32> to vector<4x16x8xf32>
    %66 = arith.subf %62, %65 : vector<4x16x8xf32>
    %67 = math.exp %66 : vector<4x16x8xf32>
    %cst_11 = arith.constant dense<0.000000e+00> : vector<4x16xf32>
    %68 = vector.multi_reduction <add>, %67, %cst_11 [2] : vector<4x16x8xf32> to vector<4x16xf32>
    %69 = vector.shape_cast %68 : vector<4x16xf32> to vector<4x16x1xf32>
    %cst_12 = arith.constant 0.000000e+00 : f32
    %70 = vector.broadcast %cst_12 : f32 to vector<4x16x1xf32>
    %71 = arith.subf %70, %64 : vector<4x16x1xf32>
    %72 = math.exp %71 : vector<4x16x1xf32>
    %cst_13 = arith.constant 1.000000e+00 : f32
    %73 = vector.broadcast %cst_13 : f32 to vector<4x16x1xf32>
    %74 = arith.mulf %73, %72 : vector<4x16x1xf32>
    %75 = arith.addf %69, %74 : vector<4x16x1xf32>
    %76 = tpu.reciprocal %75 {approx = true} : vector<4x16x1xf32> -> vector<4x16x1xf32>
    %77 = vector.broadcast %76 : vector<4x16x1xf32> to vector<4x16x8xf32>
    %78 = arith.mulf %67, %77 : vector<4x16x8xf32>
    %79 = arith.truncf %78 : vector<4x16x8xf32> to vector<4x16x8xbf16>
    %cst_14 = arith.constant dense<0.000000e+00> : vector<4x16x64xf32>
    %80 = tpu.matmul %79, %51, %cst_14 {dimension_numbers = #tpu.dot_dimension_numbers<[2], [1], [1], [2], [0, 0, 0, 1, 1, 2], [0], [0]>} : vector<4x16x8xbf16>, vector<4x8x64xbf16>, vector<4x16x64xf32> -> vector<4x16x64xf32>
    %81 = vector.extract_strided_slice %80 {offsets = [0, 0, 0], sizes = [1, 8, 64], strides = [1, 1, 1]} : vector<4x16x64xf32> to vector<1x8x64xf32>
    %82 = vector.shape_cast %81 : vector<1x8x64xf32> to vector<8x64xf32>
    %83 = vector.extract_strided_slice %80 {offsets = [0, 8, 0], sizes = [1, 8, 64], strides = [1, 1, 1]} : vector<4x16x64xf32> to vector<1x8x64xf32>
    %84 = vector.shape_cast %83 : vector<1x8x64xf32> to vector<8x64xf32>
    %85 = vector.extract_strided_slice %80 {offsets = [1, 0, 0], sizes = [1, 8, 64], strides = [1, 1, 1]} : vector<4x16x64xf32> to vector<1x8x64xf32>
    %86 = vector.shape_cast %85 : vector<1x8x64xf32> to vector<8x64xf32>
    %87 = vector.extract_strided_slice %80 {offsets = [1, 8, 0], sizes = [1, 8, 64], strides = [1, 1, 1]} : vector<4x16x64xf32> to vector<1x8x64xf32>
    %88 = vector.shape_cast %87 : vector<1x8x64xf32> to vector<8x64xf32>
    %89 = tpu.concatenate %82, %84, %86, %88 in 1 : vector<8x64xf32>, vector<8x64xf32>, vector<8x64xf32>, vector<8x64xf32> -> vector<8x256xf32>
    %90 = vector.extract_strided_slice %80 {offsets = [2, 0, 0], sizes = [1, 8, 64], strides = [1, 1, 1]} : vector<4x16x64xf32> to vector<1x8x64xf32>
    %91 = vector.shape_cast %90 : vector<1x8x64xf32> to vector<8x64xf32>
    %92 = vector.extract_strided_slice %80 {offsets = [2, 8, 0], sizes = [1, 8, 64], strides = [1, 1, 1]} : vector<4x16x64xf32> to vector<1x8x64xf32>
    %93 = vector.shape_cast %92 : vector<1x8x64xf32> to vector<8x64xf32>
    %94 = vector.extract_strided_slice %80 {offsets = [3, 0, 0], sizes = [1, 8, 64], strides = [1, 1, 1]} : vector<4x16x64xf32> to vector<1x8x64xf32>
    %95 = vector.shape_cast %94 : vector<1x8x64xf32> to vector<8x64xf32>
    %96 = vector.extract_strided_slice %80 {offsets = [3, 8, 0], sizes = [1, 8, 64], strides = [1, 1, 1]} : vector<4x16x64xf32> to vector<1x8x64xf32>
    %97 = vector.shape_cast %96 : vector<1x8x64xf32> to vector<8x64xf32>
    %98 = tpu.concatenate %91, %93, %95, %97 in 1 : vector<8x64xf32>, vector<8x64xf32>, vector<8x64xf32>, vector<8x64xf32> -> vector<8x256xf32>
    %99 = tpu.concatenate %89, %98 in 0 : vector<8x256xf32>, vector<8x256xf32> -> vector<16x256xf32>
    %100 = arith.truncf %99 : vector<16x256xf32> to vector<16x256xbf16>
    %c0_15 = arith.constant 0 : index
    %c0_16 = arith.constant 0 : index
    %101 = vector.load %arg3[%c0_15, %c0_16] : memref<256x256xbf16, #tpu.memory_space<vmem>>, vector<256x256xbf16>
    %cst_17 = arith.constant dense<0.000000e+00> : vector<16x256xf32>
    %102 = tpu.matmul %100, %101, %cst_17 {dimension_numbers = #tpu.dot_dimension_numbers<[1], [0], [0], [1], [0, 0, 1, 1], [], []>} : vector<16x256xbf16>, vector<256x256xbf16>, vector<16x256xf32> -> vector<16x256xf32>
    %c0_18 = arith.constant 0 : index
    %c0_19 = arith.constant 0 : index
    %103 = vector.load %arg6[%c0_18, %c0_19] : memref<16x256xf32, #tpu.memory_space<vmem>>, vector<16x256xf32>
    tpu.vector_store %arg6[%c0_18, %c0_19], %102 {strides = array<i32>} : memref<16x256xf32, #tpu.memory_space<vmem>>, vector<16x256xf32>,
    return
  }
  func.func @transform_0(%arg0: i32) -> (i32, i32) {
    %c0_i32 = arith.constant 0 : i32
    %c0_i32_0 = arith.constant 0 : i32
    %c0_i32_1 = arith.constant 0 : i32
    return %c0_i32, %c0_i32_0 : i32, i32
  }
  func.func @transform_1(%arg0: i32) -> (i32, i32) {
    %c0_i32 = arith.constant 0 : i32
    %c0_i32_0 = arith.constant 0 : i32
    %c0_i32_1 = arith.constant 0 : i32
    return %c0_i32, %c0_i32_0 : i32, i32
  }
  func.func @transform_2(%arg0: i32) -> (i32, i32) {
    %c0_i32 = arith.constant 0 : i32
    %c0_i32_0 = arith.constant 0 : i32
    %c0_i32_1 = arith.constant 0 : i32
    return %c0_i32, %c0_i32_0 : i32, i32
  }
  func.func @transform_3(%arg0: i32) -> (i32, i32) {
    %c0_i32 = arith.constant 0 : i32
    %c0_i32_0 = arith.constant 0 : i32
    %c0_i32_1 = arith.constant 0 : i32
    return %c0_i32, %c0_i32_0 : i32, i32
  }
  func.func @transform_4(%arg0: i32) -> (i32, i32) {
    %c0_i32 = arith.constant 0 : i32
    %c0_i32_0 = arith.constant 0 : i32
    %c0_i32_1 = arith.constant 0 : i32
    return %c0_i32, %c0_i32_0 : i32, i32
  }
  func.func @transform_5(%arg0: i32) -> (i32, i32) {
    %c0_i32 = arith.constant 0 : i32
    %c0_i32_0 = arith.constant 0 : i32
    %c0_i32_1 = arith.constant 0 : i32
    return %c0_i32, %c0_i32_0 : i32, i32
  }
}

</mosaic_0001>

<bundles_post_ra>
// kernel: tpu_custom_call.1
= control target key start
LH: loop header
LB: loop body
LE: loop exit
PB: predicated region body
PF: predicated region fallthrough
CT: control target
= control target key end

     0   :  { %10 = vsyncpa [#allocation3], 0  ;;  %s2761_s0 = inlined_call_operand.hbm [shape: f32[16,256], index: 0, kind: input, shape index: {}]   ;;  %s2762_s1 = inlined_call_operand.hbm [shape: bf16[256,896], index: 1, kind: input, shape index: {}]   ;;  %s2763_s2 = inlined_call_operand.hbm [shape: bf16[256,256], index: 2, kind: input, shape index: {}]   ;;  %s2764_s3 = inlined_call_operand.hbm [shape: f32[16,384], index: 3, kind: input, shape index: {}]   ;;  %s2765_s4 = inlined_call_operand.hbm [shape: f32[16,384], index: 4, kind: input, shape index: {}]   ;;  %s2766_s5 = inlined_call_operand.hbm [shape: f32[16,256], index: 5, kind: output, shape index: {}]  }
   0x1   :  { %11 = vsyncpa [#allocation6], 0 }
   0x2   :  { %12 = vsyncpa [#allocation9], 0 }
   0x3   :  { %13 = vsyncpa [#allocation4], 0  ;;  %s2505_s18 = smov [#allocation5]   ;;  %s2365_s22 = scalar_lea.hbm %s2762_s1, 14336 }
   0x4   :  { %s31_s19 = sshll.u32 %s2505_s18, 4  ;;  %p2366_p0 = scmp.ne.s32.totalorder %s2762_s1, %s2365_s22  ;;  %s32_s19 = int_to_ptr.vmem [resolvable:$true] %s31_s19 }
   0x5   :  { %p2369_p1 = scmp.lt.u32.totalorder %s2365_s22, %s2762_s1 }
   0x7   :  { %p2371_p2 = pnand %p2369_p1, %p2366_p0 }
   0x9   :  { %2374 = shalt.err (!%p2371_p2)
}
   0xa   :  { %s2375_s27 = scalar_lea.vmem %s32_s19, 14336  ;;  %p2380_p4 = scmp.lt.s32.totalorder %s32_s19, %s32_s19 }
   0xb   :  { %p2376_p3 = scmp.ne.s32.totalorder %s32_s19, %s2375_s27  ;;  %p2381_p5 = scmp.lt.s32.totalorder %s2375_s27, %s2375_s27 }
   0xd   :  { %p2382_p6 = por %p2381_p5, %p2380_p4 }
   0xf   :  { %p2383_p7 = pnand %p2382_p6, %p2376_p3 }
  0x11   :  { %2386 = shalt.err (!%p2383_p7)
}
  0x12   :  { %s2506_s28 = smov 448   ;;  %s2507_s29 = smov 28  }
  0x13   :  { %37 = dma.hbm_to_vmem [thread:$0]  %s2762_s1, 14336, %s32_s19, [#allocation6], %s2506_s28, %s2506_s28, %s2507_s29  }
  0x14   :  { %s2508_s7 = smov [#allocation8]   ;;  %s2387_s11 = scalar_lea.hbm %s2764_s3, 768 }
  0x15   :  { %s55_s8 = sshll.u32 %s2508_s7, 4  ;;  %p2388_p8 = scmp.ne.s32.totalorder %s2764_s3, %s2387_s11  ;;  %s56_s8 = int_to_ptr.vmem [resolvable:$true] %s55_s8 }
  0x16   :  { %p2391_p9 = scmp.lt.u32.totalorder %s2387_s11, %s2764_s3 }
  0x18   :  { %p2393_p10 = pnand %p2391_p9, %p2388_p8 }
  0x1a   :  { %2396 = shalt.err (!%p2393_p10)
}
  0x1b   :  { %s2397_s16 = scalar_lea.vmem %s56_s8, 768  ;;  %p2402_p12 = scmp.lt.s32.totalorder %s56_s8, %s56_s8 }
  0x1c   :  { %p2398_p11 = scmp.ne.s32.totalorder %s56_s8, %s2397_s16  ;;  %p2403_p13 = scmp.lt.s32.totalorder %s2397_s16, %s2397_s16 }
  0x1e   :  { %p2404_p0 = por %p2403_p13, %p2402_p12 }
  0x20   :  { %p2405_p1 = pnand %p2404_p0, %p2398_p11 }
  0x22   :  { %2408 = shalt.err (!%p2405_p1)
}
  0x23   :  { %s2509_s1 = smov 384   ;;  %s2510_s17 = smov 24  }
  0x24   :  { %61 = dma.hbm_to_vmem [thread:$0]  %s2764_s3, 768, %s56_s8, [#allocation9], %s2509_s1, %s2509_s1, %s2510_s17  }
  0x25   :  { %s2511_s20 = smov [#allocation2]   ;;  %s2409_s24 = scalar_lea.hbm %s2761_s0, 512 }
  0x26   :  { %s19_s21 = sshll.u32 %s2511_s20, 4  ;;  %p2410_p2 = scmp.ne.s32.totalorder %s2761_s0, %s2409_s24  ;;  %s20_s21 = int_to_ptr.vmem [resolvable:$true] %s19_s21 }
  0x27   :  { %p2413_p3 = scmp.lt.u32.totalorder %s2409_s24, %s2761_s0 }
  0x29   :  { %p2415_p4 = pnand %p2413_p3, %p2410_p2 }
  0x2b   :  { %2418 = shalt.err (!%p2415_p4)
}
  0x2c   :  { %s2419_s29 = scalar_lea.vmem %s20_s21, 512  ;;  %p2424_p6 = scmp.lt.s32.totalorder %s20_s21, %s20_s21 }
  0x2d   :  { %p2420_p5 = scmp.ne.s32.totalorder %s20_s21, %s2419_s29  ;;  %p2425_p7 = scmp.lt.s32.totalorder %s2419_s29, %s2419_s29 }
  0x2f   :  { %p2426_p8 = por %p2425_p7, %p2424_p6 }
  0x31   :  { %p2427_p9 = pnand %p2426_p8, %p2420_p5 }
  0x33   :  { %2430 = shalt.err (!%p2427_p9)
}
  0x34   :  { %s2512_s3 = smov 256   ;;  %s2513_s30 = smov 16  }
  0x35   :  { %25 = dma.hbm_to_vmem [thread:$0]  %s2761_s0, 512, %s20_s21, [#allocation3], %s2512_s3, %s2512_s3, %s2513_s30  }
  0x36   :  { %s2514_s8 = smov [#allocation7]   ;;  %s2431_s12 = scalar_lea.hbm %s2763_s2, 4096 }
  0x37   :  { %s43_s9 = sshll.u32 %s2514_s8, 4  ;;  %p2432_p10 = scmp.ne.s32.totalorder %s2763_s2, %s2431_s12  ;;  %s44_s9 = int_to_ptr.vmem [resolvable:$true] %s43_s9 }
  0x38   :  { %p2435_p11 = scmp.lt.u32.totalorder %s2431_s12, %s2763_s2 }
  0x3a   :  { %p2437_p12 = pnand %p2435_p11, %p2432_p10 }
  0x3c   :  { %2440 = shalt.err (!%p2437_p12)
}
  0x3d   :  { %s2441_s18 = scalar_lea.vmem %s44_s9, 4096  ;;  %p2446_p0 = scmp.lt.s32.totalorder %s44_s9, %s44_s9 }
  0x3e   :  { %p2442_p13 = scmp.ne.s32.totalorder %s44_s9, %s2441_s18  ;;  %p2447_p1 = scmp.lt.s32.totalorder %s2441_s18, %s2441_s18 }
  0x40   :  { %p2448_p2 = por %p2447_p1, %p2446_p0 }
  0x42   :  { %p2449_p3 = pnand %p2448_p2, %p2442_p13 }
  0x44   :  { %2452 = shalt.err (!%p2449_p3)
}
  0x45   :  { %s2515_s0 = smov 128   ;;  %s2516_s19 = smov 8  }
  0x46   :  { %49 = dma.hbm_to_vmem [thread:$0]  %s2763_s2, 4096, %s44_s9, [#allocation6], %s2515_s0, %s2515_s0, %s2516_s19  }
  0x47   :  { %s2517_s22 = smov [#allocation10]   ;;  %s2453_s26 = scalar_lea.hbm %s2765_s4, 768 }
  0x48   :  { %s67_s23 = sshll.u32 %s2517_s22, 4  ;;  %p2454_p4 = scmp.ne.s32.totalorder %s2765_s4, %s2453_s26  ;;  %s68_s23 = int_to_ptr.vmem [resolvable:$true] %s67_s23 }
  0x49   :  { %p2457_p5 = scmp.lt.u32.totalorder %s2453_s26, %s2765_s4 }
  0x4b   :  { %p2459_p6 = pnand %p2457_p5, %p2454_p4 }
  0x4d   :  { %2462 = shalt.err (!%p2459_p6)
}
  0x4e   :  { %s2463_s7 = scalar_lea.vmem %s68_s23, 768  ;;  %p2468_p8 = scmp.lt.s32.totalorder %s68_s23, %s68_s23 }
  0x4f   :  { %p2464_p7 = scmp.ne.s32.totalorder %s68_s23, %s2463_s7  ;;  %p2469_p9 = scmp.lt.s32.totalorder %s2463_s7, %s2463_s7 }
  0x51   :  { %p2470_p10 = por %p2469_p9, %p2468_p8 }
  0x53   :  { %p2471_p11 = pnand %p2470_p10, %p2464_p7 }
  0x55   :  { %2474 = shalt.err (!%p2471_p11)
}
  0x56   :  { %73 = dma.hbm_to_vmem [thread:$0]  %s2765_s4, 768, %s68_s23, [#allocation9], %s2509_s1, %s2509_s1, %s2510_s17  }
  0x57   :  { %2497 = dma.done.wait [#allocation3], 512  }
  0x58   :  { %2498 = vsyncadd [#allocation3], 4294966784 }
  0x59   :  { %2499 = dma.done.wait [#allocation6], 18432  }
  0x5a   :  { %2500 = vsyncadd [#allocation6], 4294948864 }
  0x5b   :  { %2501 = dma.done.wait [#allocation9], 1536  }
  0x5c   :  { %2502 = vsyncadd [#allocation9], 4294965760  ;;  %v2109_v0 = vld [vmem:[#allocation5 + $0x4] ss:$28 sps:$4 sm:$0xff]   ;;  %v2111_v1 = vld [vmem:[#allocation5 + $0xc] ss:$28 sps:$4 sm:$0xff]  }
  0x5d   :  { %800 = vmatprep.subr.bf16.mxu0 %v2109_v0  ;;  %v2113_v2 = vld [vmem:[#allocation5] ss:$28 sps:$4 sm:$0xff]   ;;  %v2114_v3 = vld [vmem:[#allocation5 + $0x8] ss:$28 sps:$4 sm:$0xff]   ;;  %843 = vmatprep.subr.bf16.mxu1 %v2111_v1  ;;  %v2119_v6 = vld [vmem:[#allocation5 + $0x38] ss:$28 sps:$4 sm:$0xff]  }
  0x5e   :  { %v2115_v4 = vld [vmem:[#allocation5 + $0x3c] ss:$28 sps:$4 sm:$0xff]   ;;  %801 = vmatpush1.bf16.msra.mxu0 %v2113_v2  ;;  %844 = vmatpush1.bf16.msra.mxu1 %v2114_v3  ;;  %v2117_v5 = vld [vmem:[#allocation5 + $0x44] ss:$28 sps:$4 sm:$0xff]   ;;  %v2121_v8 = vld [vmem:[#allocation5 + $0x74] ss:$28 sps:$4 sm:$0xff]  }
  0x5f   :  { %802 = vmatprep.subr.bf16.mxu0 %v2115_v4  ;;  %v2120_v7 = vld [vmem:[#allocation5 + $0x40] ss:$28 sps:$4 sm:$0xff]   ;;  %845 = vmatprep.subr.bf16.mxu1 %v2117_v5  ;;  %v2125_v10 = vld [vmem:[#allocation5 + $0x70] ss:$28 sps:$4 sm:$0xff]   ;;  %v2126_v11 = vld [vmem:[#allocation5 + $0x78] ss:$28 sps:$4 sm:$0xff]  }
  0x60   :  { %v2123_v9 = vld [vmem:[#allocation5 + $0x7c] ss:$28 sps:$4 sm:$0xff]   ;;  %v2127_v12 = vld [vmem:[#allocation5 + $0xac] ss:$28 sps:$4 sm:$0xff]   ;;  %v2129_v13 = vld [vmem:[#allocation5 + $0xb4] ss:$28 sps:$4 sm:$0xff]  }
  0x61   :  { %v2131_v14 = vld [vmem:[#allocation5 + $0xa8] ss:$28 sps:$4 sm:$0xff]   ;;  %v2132_v15 = vld [vmem:[#allocation5 + $0xb0] ss:$28 sps:$4 sm:$0xff]   ;;  %v2137_v18 = vld [vmem:[#allocation5 + $0xe0] ss:$28 sps:$4 sm:$0xff]  }
  0x62   :  { %803 = vmatpush1.bf16.msra.mxu0 %v2119_v6  ;;  %846 = vmatpush1.bf16.msra.mxu1 %v2120_v7  ;;  %v2133_v16 = vld [vmem:[#allocation5 + $0xe4] ss:$28 sps:$4 sm:$0xff]   ;;  %v2135_v17 = vld [vmem:[#allocation5 + $0xec] ss:$28 sps:$4 sm:$0xff]   ;;  %v2139_v20 = vld [vmem:[#allocation5 + $0x11c] ss:$28 sps:$4 sm:$0xff]  }
  0x63   :  { %804 = vmatprep.subr.bf16.mxu0 %v2121_v8  ;;  %847 = vmatprep.subr.bf16.mxu1 %v2123_v9  ;;  %v2138_v19 = vld [vmem:[#allocation5 + $0xe8] ss:$28 sps:$4 sm:$0xff]   ;;  %v2143_v22 = vld [vmem:[#allocation5 + $0x118] ss:$28 sps:$4 sm:$0xff]   ;;  %v2144_v23 = vld [vmem:[#allocation5 + $0x120] ss:$28 sps:$4 sm:$0xff]  }
  0x64   :  { %v2141_v21 = vld [vmem:[#allocation5 + $0x124] ss:$28 sps:$4 sm:$0xff]   ;;  %v2145_v24 = vld [vmem:[#allocation5 + $0x154] ss:$28 sps:$4 sm:$0xff]   ;;  %v2147_v25 = vld [vmem:[#allocation5 + $0x15c] ss:$28 sps:$4 sm:$0xff]  }
  0x65   :  { %v2149_v26 = vld [vmem:[#allocation5 + $0x150] ss:$28 sps:$4 sm:$0xff]   ;;  %v2150_v27 = vld [vmem:[#allocation5 + $0x158] ss:$28 sps:$4 sm:$0xff]   ;;  %v2155_v30 = vld [vmem:[#allocation5 + $0x188] ss:$28 sps:$4 sm:$0xff]  }
  0x66   :  { %805 = vmatpush1.bf16.msra.mxu0 %v2125_v10  ;;  %848 = vmatpush1.bf16.msra.mxu1 %v2126_v11  ;;  %v2151_v28 = vld [vmem:[#allocation5 + $0x18c] ss:$28 sps:$4 sm:$0xff]   ;;  %v2153_v29 = vld [vmem:[#allocation5 + $0x194] ss:$28 sps:$4 sm:$0xff]   ;;  %v2157_v32 = vld [vmem:[#allocation5 + $0x1c4] ss:$28 sps:$4 sm:$0xff]  }
  0x67   :  { %806 = vmatprep.subr.bf16.mxu0 %v2127_v12  ;;  %849 = vmatprep.subr.bf16.mxu1 %v2129_v13  ;;  %v2156_v31 = vld [vmem:[#allocation5 + $0x190] ss:$28 sps:$4 sm:$0xff]   ;;  %v2161_v34 = vld [vmem:[#allocation5 + $0x1c0] ss:$28 sps:$4 sm:$0xff]   ;;  %v2162_v35 = vld [vmem:[#allocation5 + $0x1c8] ss:$28 sps:$4 sm:$0xff]  }
  0x68   :  { %v2159_v33 = vld [vmem:[#allocation5 + $0x1cc] ss:$28 sps:$4 sm:$0xff]   ;;  %v2163_v36 = vld [vmem:[#allocation5 + $0x1fc] ss:$28 sps:$4 sm:$0xff]   ;;  %v2165_v37 = vld [vmem:[#allocation5 + $0x204] ss:$28 sps:$4 sm:$0xff]  }
  0x69   :  { %v2167_v38 = vld [vmem:[#allocation5 + $0x1f8] ss:$28 sps:$4 sm:$0xff]   ;;  %v2168_v39 = vld [vmem:[#allocation5 + $0x200] ss:$28 sps:$4 sm:$0xff]   ;;  %v2173_v42 = vld [vmem:[#allocation5 + $0x230] ss:$28 sps:$4 sm:$0xff]  }
  0x6a   :  { %807 = vmatpush1.bf16.msra.mxu0 %v2131_v14  ;;  %850 = vmatpush1.bf16.msra.mxu1 %v2132_v15  ;;  %v2169_v40 = vld [vmem:[#allocation5 + $0x234] ss:$28 sps:$4 sm:$0xff]   ;;  %v2171_v41 = vld [vmem:[#allocation5 + $0x23c] ss:$28 sps:$4 sm:$0xff]   ;;  %v2175_v44 = vld [vmem:[#allocation5 + $0x26c] ss:$28 sps:$4 sm:$0xff]  }
  0x6b   :  { %808 = vmatprep.subr.bf16.mxu0 %v2133_v16  ;;  %851 = vmatprep.subr.bf16.mxu1 %v2135_v17  ;;  %v2174_v43 = vld [vmem:[#allocation5 + $0x238] ss:$28 sps:$4 sm:$0xff]   ;;  %v91_v46 = vld [vmem:[#allocation2 + $0x8] sm:$0xff]  ;;  %v2181_v50 = vld [vmem:[#allocation5 + $0x2a4] ss:$28 sps:$4 sm:$0xff]   ;;  %vm2519_vm0 = vmmov 0  }
  0x6c   :  { %v2177_v45 = vld [vmem:[#allocation5 + $0x274] ss:$28 sps:$4 sm:$0xff]   ;;  %v2179_v47 = vld [vmem:[#allocation5 + $0x268] ss:$28 sps:$4 sm:$0xff]   ;;  %v93_v49 = vld [vmem:[#allocation2 + $0x18] sm:$0xff]  ;;  %vm1050_vm1 = vcmask 523264  }
  0x6d   :  { %v2180_v48 = vld [vmem:[#allocation5 + $0x270] ss:$28 sps:$4 sm:$0xff]   ;;  %v95_v51 = vpack.c.bf16 %v93_v49, %v91_v46  ;;  %v2185_v53 = vld [vmem:[#allocation5 + $0x2a0] ss:$28 sps:$4 sm:$0xff]   ;;  %v2186_v54 = vld [vmem:[#allocation5 + $0x2a8] ss:$28 sps:$4 sm:$0xff]  }
  0x6e   :  { %809 = vmatpush1.bf16.msra.mxu0 %v2137_v18  ;;  %852 = vmatpush1.bf16.msra.mxu1 %v2138_v19  ;;  %v2183_v52 = vld [vmem:[#allocation5 + $0x2ac] ss:$28 sps:$4 sm:$0xff]   ;;  %v2187_v55 = vld [vmem:[#allocation5 + $0x2dc] ss:$28 sps:$4 sm:$0xff]   ;;  %v2189_v56 = vld [vmem:[#allocation5 + $0x2e4] ss:$28 sps:$4 sm:$0xff]  }
  0x6f   :  { %810 = vmatprep.subr.bf16.mxu0 %v2139_v20  ;;  %853 = vmatprep.subr.bf16.mxu1 %v2141_v21  ;;  %v2191_v57 = vld [vmem:[#allocation5 + $0x2d8] ss:$28 sps:$4 sm:$0xff]   ;;  %v2192_v58 = vld [vmem:[#allocation5 + $0x2e0] ss:$28 sps:$4 sm:$0xff]   ;;  %v2197_v61 = vld [vmem:[#allocation5 + $0x310] ss:$28 sps:$4 sm:$0xff]  }
  0x70   :  { %832 = vmatprep.mubr.bf16.mxu0 %v95_v51  ;;  %875 = vmatprep.mubr.bf16.mxu1 %v95_v51  ;;  %v2193_v59 = vld [vmem:[#allocation5 + $0x314] ss:$28 sps:$4 sm:$0xff]   ;;  %v2195_v60 = vld [vmem:[#allocation5 + $0x31c] ss:$28 sps:$4 sm:$0xff]   ;;  %v2199_v63 = vld [vmem:[#allocation5 + $0x34c] ss:$28 sps:$4 sm:$0xff]  }
  0x71   :  { %v2198_v62 = vld [vmem:[#allocation5 + $0x318] ss:$28 sps:$4 sm:$0xff]   ;;  %v2203_v1 = vld [vmem:[#allocation5 + $0x348] ss:$28 sps:$4 sm:$0xff]   ;;  %v2204_v2 = vld [vmem:[#allocation5 + $0x350] ss:$28 sps:$4 sm:$0xff]  }
  0x72   :  { %811 = vmatpush1.bf16.msra.mxu0 %v2143_v22  ;;  %854 = vmatpush1.bf16.msra.mxu1 %v2144_v23  ;;  %v2201_v0 = vld [vmem:[#allocation5 + $0x354] ss:$28 sps:$4 sm:$0xff]   ;;  %v90_v3 = vld [vmem:[#allocation2] sm:$0xff]  ;;  %v2210_v8 = vld [vmem:[#allocation5 + $0x4c] ss:$28 sps:$4 sm:$0xff]   ;;  %s2520_s4 = smov 64  }
  0x73   :  { %812 = vmatprep.subr.bf16.mxu0 %v2145_v24  ;;  %855 = vmatprep.subr.bf16.mxu1 %v2147_v25  ;;  %v92_v4 = vld [vmem:[#allocation2 + $0x10] sm:$0xff]  ;;  %v2208_v9 = vld [vmem:[#allocation5 + $0x48] ss:$28 sps:$4 sm:$0xff]   ;;  %v2211_v11 = vld [vmem:[#allocation5 + $0x80] ss:$28 sps:$4 sm:$0xff]   ;;  %vm1367_vm2 = vcmask 1043456  }
  0x74   :  { %v2207_v5 = vld [vmem:[#allocation5 + $0x14] ss:$28 sps:$4 sm:$0xff]   ;;  %v2622_v6 = vpack.c.bf16 %v92_v4, %v90_v3  ;;  %v2213_v10 = vld [vmem:[#allocation5 + $0x84] ss:$28 sps:$4 sm:$0xff]   ;;  %v2216_v12 = vld [vmem:[#allocation5 + $0xbc] ss:$28 sps:$4 sm:$0xff]  }
  0x75   :  { %v2205_v7 = vld [vmem:[#allocation5 + $0x10] ss:$28 sps:$4 sm:$0xff]   ;;  %v2214_v13 = vld [vmem:[#allocation5 + $0xb8] ss:$28 sps:$4 sm:$0xff]   ;;  %v2220_v17 = vld [vmem:[#allocation5 + $0x128] ss:$28 sps:$4 sm:$0xff]  }
  0x76   :  { %813 = vmatpush1.bf16.msra.mxu0 %v2149_v26  ;;  %856 = vmatpush1.bf16.msra.mxu1 %v2150_v27  ;;  %v2219_v14 = vld [vmem:[#allocation5 + $0xf4] ss:$28 sps:$4 sm:$0xff]   ;;  %v2222_v16 = vld [vmem:[#allocation5 + $0x12c] ss:$28 sps:$4 sm:$0xff]   ;;  %v2225_v18 = vld [vmem:[#allocation5 + $0x164] ss:$28 sps:$4 sm:$0xff]  }
  0x77   :  { %814 = vmatprep.subr.bf16.mxu0 %v2151_v28  ;;  %857 = vmatprep.subr.bf16.mxu1 %v2153_v29  ;;  %v2217_v15 = vld [vmem:[#allocation5 + $0xf0] ss:$28 sps:$4 sm:$0xff]   ;;  %v2223_v19 = vld [vmem:[#allocation5 + $0x160] ss:$28 sps:$4 sm:$0xff]   ;;  %v2226_v21 = vld [vmem:[#allocation5 + $0x198] ss:$28 sps:$4 sm:$0xff]  }
  0x78   :  { %v2228_v20 = vld [vmem:[#allocation5 + $0x19c] ss:$28 sps:$4 sm:$0xff]   ;;  %v2231_v22 = vld [vmem:[#allocation5 + $0x1d4] ss:$28 sps:$4 sm:$0xff]   ;;  %v2234_v24 = vld [vmem:[#allocation5 + $0x20c] ss:$28 sps:$4 sm:$0xff]  }
  0x79   :  { %v2229_v23 = vld [vmem:[#allocation5 + $0x1d0] ss:$28 sps:$4 sm:$0xff]   ;;  %v2232_v25 = vld [vmem:[#allocation5 + $0x208] ss:$28 sps:$4 sm:$0xff]   ;;  %v2235_v27 = vld [vmem:[#allocation5 + $0x240] ss:$28 sps:$4 sm:$0xff]  }
  0x7a   :  { %815 = vmatpush1.bf16.msra.mxu0 %v2155_v30  ;;  %858 = vmatpush1.bf16.msra.mxu1 %v2156_v31  ;;  %v2237_v26 = vld [vmem:[#allocation5 + $0x244] ss:$28 sps:$4 sm:$0xff]   ;;  %v2240_v28 = vld [vmem:[#allocation5 + $0x27c] ss:$28 sps:$4 sm:$0xff]   ;;  %v2243_v30 = vld [vmem:[#allocation5 + $0x2b4] ss:$28 sps:$4 sm:$0xff]  }
  0x7b   :  { %816 = vmatprep.subr.bf16.mxu0 %v2157_v32  ;;  %859 = vmatprep.subr.bf16.mxu1 %v2159_v33  ;;  %v2238_v29 = vld [vmem:[#allocation5 + $0x278] ss:$28 sps:$4 sm:$0xff]   ;;  %v2241_v31 = vld [vmem:[#allocation5 + $0x2b0] ss:$28 sps:$4 sm:$0xff]   ;;  %v2244_v33 = vld [vmem:[#allocation5 + $0x2e8] ss:$28 sps:$4 sm:$0xff]  }
  0x7c   :  { %v2246_v32 = vld [vmem:[#allocation5 + $0x2ec] ss:$28 sps:$4 sm:$0xff]   ;;  %v2261_v46 = vld [vmem:[#allocation5 + $0x2b8] ss:$28 sps:$4 sm:$0xff]   ;;  %vm1239_vm4 = vcmask 64512   ;;  %s2522_s1 = smov [#allocation11]  }
  0x7d   :  { %v2264_v49 = vld [vmem:[#allocation5 + $0x130] ss:$28 sps:$4 sm:$0xff]   ;;  %s1819_s17 = sshll.u32 %s2522_s1, 4  ;;  %s1820_s17 = int_to_ptr.vmem [resolvable:$true] %s1819_s17 }
  0x7e   :  { %817 = vmatpush1.bf16.msra.mxu0 %v2161_v34  ;;  %860 = vmatpush1.bf16.msra.mxu1 %v2162_v35  ;;  %v2249_v34 = vld [vmem:[#allocation5 + $0x324] ss:$28 sps:$4 sm:$0xff]   ;;  %s2475_s9 = scalar_lea.vmem %s1820_s17, 512  ;;  %p2480_p13 = scmp.lt.s32.totalorder %s1820_s17, %s1820_s17 }
  0x7f   :  { %818 = vmatprep.subr.bf16.mxu0 %v2163_v36  ;;  %861 = vmatprep.subr.bf16.mxu1 %v2165_v37  ;;  %v2247_v35 = vld [vmem:[#allocation5 + $0x320] ss:$28 sps:$4 sm:$0xff]   ;;  %v2250_v37 = vld [vmem:[#allocation5 + $0x358] ss:$28 sps:$4 sm:$0xff]   ;;  %p2476_p12 = scmp.ne.s32.totalorder %s1820_s17, %s2475_s9  ;;  %p2481_p0 = scmp.lt.s32.totalorder %s2475_s9, %s2475_s9 }
  0x80   :  { %v2252_v36 = vld [vmem:[#allocation5 + $0x35c] ss:$28 sps:$4 sm:$0xff]  }
  0x81   :  { %p2482_p1 = por %p2481_p0, %p2480_p13 }
  0x82   :  { %819 = vmatpush1.bf16.msra.mxu0 %v2167_v38  ;;  %862 = vmatpush1.bf16.msra.mxu1 %v2168_v39  ;;  %v2253_v38 = vld [vmem:[#allocation5 + $0x1d8] ss:$28 sps:$4 sm:$0xff]  }
  0x83   :  { %820 = vmatprep.subr.bf16.mxu0 %v2169_v40  ;;  %863 = vmatprep.subr.bf16.mxu1 %v2171_v41  ;;  %v2254_v39 = vld [vmem:[#allocation5 + $0x18] ss:$28 sps:$4 sm:$0xff]   ;;  %v2255_v40 = vld [vmem:[#allocation5 + $0x210] ss:$28 sps:$4 sm:$0xff]   ;;  %p2483_p2 = pnand %p2482_p1, %p2476_p12 }
  0x84   :  { %v2256_v41 = vld [vmem:[#allocation5 + $0x50] ss:$28 sps:$4 sm:$0xff]  }
  0x86   :  { %821 = vmatpush1.bf16.msra.mxu0 %v2173_v42  ;;  %864 = vmatpush1.bf16.msra.mxu1 %v2174_v43  ;;  %v2257_v42 = vld [vmem:[#allocation5 + $0x248] ss:$28 sps:$4 sm:$0xff]  }
  0x87   :  { %822 = vmatprep.subr.bf16.mxu0 %v2175_v44  ;;  %865 = vmatprep.subr.bf16.mxu1 %v2177_v45  ;;  %v2258_v43 = vld [vmem:[#allocation5 + $0x88] ss:$28 sps:$4 sm:$0xff]   ;;  %v2259_v44 = vld [vmem:[#allocation5 + $0x280] ss:$28 sps:$4 sm:$0xff]  }
  0x88   :  { %v2260_v45 = vld [vmem:[#allocation5 + $0xc0] ss:$28 sps:$4 sm:$0xff]  }
  0x8a   :  { %823 = vmatpush1.bf16.msra.mxu0 %v2179_v47  ;;  %866 = vmatpush1.bf16.msra.mxu1 %v2180_v48  ;;  %v2262_v47 = vld [vmem:[#allocation5 + $0xf8] ss:$28 sps:$4 sm:$0xff]   ;;  %v2263_v48 = vld [vmem:[#allocation5 + $0x2f0] ss:$28 sps:$4 sm:$0xff]  }
  0x8b   :  { %824 = vmatprep.subr.bf16.mxu0 %v2181_v50  ;;  %867 = vmatprep.subr.bf16.mxu1 %v2183_v52  ;;  %v2265_v50 = vld [vmem:[#allocation5 + $0x328] ss:$28 sps:$4 sm:$0xff]   ;;  %v2267_v52 = vld [vmem:[#allocation5 + $0x360] ss:$28 sps:$4 sm:$0xff]  }
  0x8e   :  { %825 = vmatpush1.bf16.msra.mxu0 %v2185_v53  ;;  %868 = vmatpush1.bf16.msra.mxu1 %v2186_v54  ;;  %v2268_v53 = vld [vmem:[#allocation5 + $0x1a0] ss:$28 sps:$4 sm:$0xff]   ;;  %v2518_v54 = vmov 0.0  }
  0x8f   :  { %826 = vmatprep.subr.bf16.mxu0 %v2187_v55  ;;  %869 = vmatprep.subr.bf16.mxu1 %v2189_v56  ;;  %v970_v55 = vld [vmem:[#allocation8] sm:$0xff]  ;;  %v982_v56 = vld [vmem:[#allocation10] sm:$0xff] }
  0x92   :  { %827 = vmatpush1.bf16.msra.mxu0 %v2191_v57  ;;  %870 = vmatpush1.bf16.msra.mxu1 %v2192_v58 }
  0x93   :  { %828 = vmatprep.subr.bf16.mxu0 %v2193_v59  ;;  %871 = vmatprep.subr.bf16.mxu1 %v2195_v60  ;;  %v973_v59 = vld [vmem:[#allocation8 + $0x18] sm:$0xff] }
  0x96   :  { %829 = vmatpush1.bf16.msra.mxu0 %v2197_v61  ;;  %872 = vmatpush1.bf16.msra.mxu1 %v2198_v62 }
  0x97   :  { %830 = vmatprep.subr.bf16.mxu0 %v2199_v63  ;;  %873 = vmatprep.subr.bf16.mxu1 %v2201_v0  ;;  %v985_v63 = vld [vmem:[#allocation10 + $0x18] sm:$0xff] }
  0x9a   :  { %831 = vmatpush1.bf16.msra.mxu0 %v2203_v1  ;;  %874 = vmatpush1.bf16.msra.mxu1 %v2204_v2 }
  0x9b   :  { %886 = vmatprep.subr.bf16.mxu0 %v2207_v5  ;;  %1985 = vmatprep.subr.bf16.mxu1 %v2253_v38 }
  0x9d   :  { %833 = vmatmul.mubr.bf16.vlgmr.msra.gmra.mrb[0].mxu0 %v2622_v6  ;;  %876 = vmatmul.mubr.bf16.vlgmr.msra.gmra.mrb[0].mxu1 %v2622_v6 }
  0x9e   :  { %887 = vmatpush1.bf16.msra.mxu0 %v2205_v7  ;;  %918 = vmatprep.mubr.bf16.mxu0 %v95_v51 }
  0x9f   :  { %888 = vmatprep.subr.bf16.mxu0 %v2210_v8  ;;  %961 = vmatprep.mubr.bf16.mxu1 %v95_v51  ;;  %v2266_v51 = vld [vmem:[#allocation5 + $0x168] ss:$28 sps:$4 sm:$0xff]  }
  0xa0   :  { %1986 = vmatpush3.bf16.msra.mxu1 %v2254_v39 }
  0xa1   :  { %1987 = vmatprep.subr.bf16.mxu1 %v2255_v40 }
  0xa2   :  { %889 = vmatpush1.bf16.msra.mxu0 %v2208_v9  ;;  %v972_v9 = vld [vmem:[#allocation8 + $0x10] sm:$0xff] }
  0xa3   :  { %890 = vmatprep.subr.bf16.mxu0 %v2213_v10  ;;  %v971_v10 = vld [vmem:[#allocation8 + $0x8] sm:$0xff] }
  0xa4   :  { %1988 = vmatpush3.bf16.msra.mxu1 %v2256_v41 }
  0xa5   :  { %1989 = vmatprep.subr.bf16.mxu1 %v2257_v42 }
  0xa6   :  { %891 = vmatpush1.bf16.msra.mxu0 %v2211_v11  ;;  %v983_v11 = vld [vmem:[#allocation10 + $0x8] sm:$0xff] }
  0xa7   :  { %892 = vmatprep.subr.bf16.mxu0 %v2216_v12  ;;  %v984_v12 = vld [vmem:[#allocation10 + $0x10] sm:$0xff] }
  0xa8   :  { %1990 = vmatpush3.bf16.msra.mxu1 %v2258_v43 }
  0xa9   :  { %1991 = vmatprep.subr.bf16.mxu1 %v2259_v44 }
  0xaa   :  { %893 = vmatpush1.bf16.msra.mxu0 %v2214_v13 }
  0xab   :  { %894 = vmatprep.subr.bf16.mxu0 %v2219_v14  ;;  %v974_v14 = vld [vmem:[#allocation8 + $0x20] sm:$0xff] }
  0xac   :  { %1992 = vmatpush3.bf16.msra.mxu1 %v2260_v45 }
  0xad   :  { %1993 = vmatprep.subr.bf16.mxu1 %v2261_v46 }
  0xae   :  { %895 = vmatpush1.bf16.msra.mxu0 %v2217_v15 }
  0xaf   :  { %896 = vmatprep.subr.bf16.mxu0 %v2222_v16  ;;  %v986_v16 = vld [vmem:[#allocation10 + $0x20] sm:$0xff] }
  0xb0   :  { %1994 = vmatpush3.bf16.msra.mxu1 %v2262_v47 }
  0xb1   :  { %1995 = vmatprep.subr.bf16.mxu1 %v2263_v48 }
  0xb2   :  { %897 = vmatpush1.bf16.msra.mxu0 %v2220_v17 }
  0xb3   :  { %898 = vmatprep.subr.bf16.mxu0 %v2225_v18  ;;  %v975_v18 = vld [vmem:[#allocation8 + $0x28] sm:$0xff] }
  0xb4   :  { %1996 = vmatpush3.bf16.msra.mxu1 %v2264_v49 }
  0xb5   :  { %1997 = vmatprep.subr.bf16.mxu1 %v2265_v50 }
  0xb6   :  { %899 = vmatpush1.bf16.msra.mxu0 %v2223_v19 }
  0xb7   :  { %900 = vmatprep.subr.bf16.mxu0 %v2228_v20 }
  0xb8   :  { %1998 = vmatpush3.bf16.msra.mxu1 %v2266_v51 }
  0xb9   :  { %1999 = vmatprep.subr.bf16.mxu1 %v2267_v52 }
  0xba   :  { %901 = vmatpush1.bf16.msra.mxu0 %v2226_v21  ;;  %v987_v21 = vld [vmem:[#allocation10 + $0x28] sm:$0xff] }
  0xbb   :  { %902 = vmatprep.subr.bf16.mxu0 %v2231_v22 }
  0xbc   :  { %2000 = vmatpush3.bf16.msra.mxu1 %v2268_v53 }
  0xbd   :  { %2023 = vmatprep.subr.bf16.mxu1 %v2518_v54 }
  0xbe   :  { %903 = vmatpush1.bf16.msra.mxu0 %v2229_v23 }
  0xbf   :  { %904 = vmatprep.subr.bf16.mxu0 %v2234_v24  ;;  %962 = vmatmul.mubr.bf16.vlgmr.msra.gmra.mrb[4].mxu1 %v2622_v6 }
  0xc0   :  { %2025 = vmatprep.mubr.msk.bf16.mxu1 %vm2519_vm0, %v2518_v54 }
  0xc2   :  { %905 = vmatpush1.bf16.msra.mxu0 %v2232_v25 }
  0xc3   :  { %906 = vmatprep.subr.bf16.mxu0 %v2237_v26 }
  0xc6   :  { %907 = vmatpush1.bf16.msra.mxu0 %v2235_v27 }
  0xc7   :  { %908 = vmatprep.subr.bf16.mxu0 %v2240_v28 }
  0xca   :  { %909 = vmatpush1.bf16.msra.mxu0 %v2238_v29 }
  0xcb   :  { %910 = vmatprep.subr.bf16.mxu0 %v2243_v30 }
  0xce   :  { %911 = vmatpush1.bf16.msra.mxu0 %v2241_v31 }
  0xcf   :  { %912 = vmatprep.subr.bf16.mxu0 %v2246_v32 }
  0xd2   :  { %913 = vmatpush1.bf16.msra.mxu0 %v2244_v33 }
  0xd3   :  { %914 = vmatprep.subr.bf16.mxu0 %v2249_v34 }
  0xd6   :  { %915 = vmatpush1.bf16.msra.mxu0 %v2247_v35 }
  0xd7   :  { %916 = vmatprep.subr.bf16.mxu0 %v2252_v36 }
  0xda   :  { %917 = vmatpush1.bf16.msra.mxu0 %v2250_v37 }
  0xdd   :  { %919 = vmatmul.mubr.bf16.vlgmr.msra.gmra.mrb[4].mxu0 %v2622_v6 }
 0x170   :  { %v834_v57 = vpop.f32.mrb[0].mxu0  ;;  %v877_v58 = vpop.f32.mrb[0].mxu1 }
 0x171   :  { %v976_v60 = vmul.f32 %v970_v55, %v834_v57  ;;  %v836_v61 = vpop.f32.mrb[1].mxu0  ;;  %v879_v62 = vpop.f32.mrb[1].mxu1  ;;  %v978_v13 = vmul.f32 %v972_v9, %v877_v58 }
 0x172   :  { %v988_v0 = vmul.f32 %v982_v56, %v879_v62  ;;  %v838_v1 = vpop.f32.mrb[2].mxu0  ;;  %v881_v2 = vpop.f32.mrb[2].mxu1  ;;  %v977_v17 = vmul.f32 %v971_v10, %v836_v61 }
 0x173   :  { %v979_v3 = vmul.f32 %v973_v59, %v838_v1  ;;  %v840_v4 = vpop.f32.mrb[3].mxu0  ;;  %v883_v5 = vpop.f32.mrb[3].mxu1  ;;  %v981_v28 = vmul.f32 %v975_v18, %v881_v2 }
 0x174   :  { %v994_v7 = vadd.f32 %v988_v0, %v976_v60  ;;  %v991_v6 = vmul.f32 %v985_v63, %v883_v5  ;;  %v980_v24 = vmul.f32 %v974_v14, %v840_v4  ;;  %v1044_v0 = vlaneseq }
 0x176   :  { %v2629_v8 = vadd.f32 %v991_v6, %v979_v3  ;;  %v1045_v1 = vshrl.u32 %v1044_v0, 7  ;;  %v1047_v2 = vand.u32 127, %v1044_v0  ;;  %v2521_v3 = vmov -1e+09  }
 0x178   :  { %vm1048_vm3 = vcmp.ge.s32.totalorder %v1045_v1, %v1047_v2 }
 0x179   :  { %v1049_v4 = vsel %vm1048_vm3, 0.0, %v2521_v3 }
 0x192   :  { %v2001_v37 = vpop.f32.mrb[4].mxu1 }
 0x193   :  { %v2002_v38 = vpop.f32.mrb[5].mxu1 }
 0x194   :  { %v2640_v39 = vadd.f32 %v2002_v38, %v2001_v37  ;;  %v2004_v40 = vpop.f32.mrb[6].mxu1 }
 0x195   :  { %v2005_v41 = vpop.f32.mrb[7].mxu1 }
 0x196   :  { %v2642_v42 = vadd.f32 %v2005_v41, %v2004_v40  ;;  %v1040_v60 = vpack.c.bf16 %v2640_v39, %v2640_v39 }
 0x198   :  { %v1369_v63 = vsel %vm1367_vm2, %v1040_v60, 0 }
 0x1b0   :  { %v920_v15 = vpop.f32.mrb[4].mxu0 }
 0x1b1   :  { %v989_v19 = vmul.f32 %v983_v11, %v920_v15  ;;  %v922_v20 = vpop.f32.mrb[5].mxu0 }
 0x1b2   :  { %v990_v22 = vmul.f32 %v984_v12, %v922_v20  ;;  %v924_v23 = vpop.f32.mrb[6].mxu0 }
 0x1b3   :  { %v995_v25 = vadd.f32 %v989_v19, %v977_v17  ;;  %v992_v26 = vmul.f32 %v986_v16, %v924_v23  ;;  %v926_v27 = vpop.f32.mrb[7].mxu0 }
 0x1b4   :  { %v996_v29 = vadd.f32 %v990_v22, %v978_v13  ;;  %v993_v30 = vmul.f32 %v987_v21, %v926_v27 }
 0x1b5   :  { %v998_v31 = vadd.f32 %v992_v26, %v980_v24 }
 0x1b6   :  { %v1028_v32 = vpack.c.bf16 %v996_v29, %v996_v29  ;;  %v999_v33 = vadd.f32 %v993_v30, %v981_v28  ;;  %v2089_v34 = vpack.i.bf16 %v996_v29, %v994_v7 }
 0x1b8   :  { %2090 = vrot.lane.b32.xlu0 %v2089_v34, %s2520_s4  ;;  %v1055_v35 = vsel %vm1050_vm1, %v1028_v32, 0  ;;  %v2094_v36 = vpack.i.bf16 %v999_v33, %v2629_v8  ;;  %v1030_v50 = vpack.c.bf16 %v999_v33, %v999_v33 }
 0x1b9   :  { %2024 = vmatpush3.bf16.xpose.msra.mxu1 %v1055_v35 }
 0x1ba   :  { %2095 = vrot.lane.b32.xlu1 %v2094_v36, %s2520_s4  ;;  %2029 = vmatprep.subr.bf16.mxu1 %v2518_v54  ;;  %v1149_v55 = vsel %vm1050_vm1, %v1030_v50, 0 }
 0x1bc   :  { %1005 = vrot.lane.b32.xlu0 %v995_v25, %s2520_s4 }
 0x1be   :  { %1013 = vrot.lane.b32.xlu1 %v998_v31, %s2520_s4 }
 0x22a   :  { %v2091_v43 = vpop.permute.xlu0 %2090 }
 0x22b   :  { %v2093_v44 = vunpack.i.h.bf16 %v2091_v43  ;;  %v2092_v45 = vunpack.i.l.bf16 %v2091_v43 }
 0x22c   :  { %v2096_v51 = vpop.permute.xlu1 %2095 }
 0x22d   :  { %v1029_v46 = vpack.c.bf16 %v2093_v44, %v2093_v44  ;;  %v1016_v47 = vpack.c.bf16 %v2092_v45, %v994_v7  ;;  %v2098_v53 = vunpack.i.h.bf16 %v2096_v51  ;;  %v2097_v56 = vunpack.i.l.bf16 %v2096_v51 }
 0x22e   :  { %v1006_v49 = vpop.permute.xlu0 %1005 }
 0x22f   :  { %2026 = vmatmul.mubr.msk.bf16.vlgmr.msra.gmra.mrb[8].mxu1 %vm1050_vm1, %v1016_v47  ;;  %v1102_v48 = vsel %vm1050_vm1, %v1029_v46, 0  ;;  %v1017_v52 = vpack.c.bf16 %v1006_v49, %v995_v25  ;;  %v1031_v57 = vpack.c.bf16 %v2098_v53, %v2098_v53  ;;  %v1018_v58 = vpack.c.bf16 %v2097_v56, %v2629_v8 }
 0x230   :  { %2030 = vmatpush3.bf16.xpose.msra.mxu1 %v1102_v48  ;;  %2031 = vmatprep.mubr.msk.bf16.mxu1 %vm2519_vm0, %v2518_v54  ;;  %v1014_v61 = vpop.permute.xlu1 %1013 }
 0x231   :  { %2035 = vmatprep.subr.bf16.mxu1 %v2518_v54  ;;  %v1196_v59 = vsel %vm1050_vm1, %v1031_v57, 0  ;;  %v1019_v62 = vpack.c.bf16 %v1014_v61, %v998_v31 }
 0x237   :  { %2032 = vmatmul.mubr.msk.bf16.vlgmr.msra.gmra.mrb[12].mxu1 %vm1050_vm1, %v1017_v52 }
 0x238   :  { %2036 = vmatpush3.bf16.xpose.msra.mxu1 %v1149_v55  ;;  %2037 = vmatprep.mubr.msk.bf16.mxu1 %vm2519_vm0, %v2518_v54 }
 0x239   :  { %2041 = vmatprep.subr.bf16.mxu1 %v2518_v54 }
 0x23f   :  { %2038 = vmatmul.mubr.msk.bf16.vlgmr.msra.gmra.mrb[16].mxu1 %vm1050_vm1, %v1018_v58 }
 0x240   :  { %2042 = vmatpush3.bf16.xpose.msra.mxu1 %v1196_v59  ;;  %2043 = vmatprep.mubr.msk.bf16.mxu1 %vm2519_vm0, %v2518_v54 }
 0x241   :  { %2047 = vmatprep.subr.bf16.mxu1 %v2518_v54 }
 0x247   :  { %2044 = vmatmul.mubr.msk.bf16.vlgmr.msra.gmra.mrb[20].mxu1 %vm1050_vm1, %v1019_v62 }
 0x248   :  { %2048 = vmatpush3.bf16.msra.mxu1 %v1369_v63  ;;  %2049 = vmatprep.mubr.msk.bf16.mxu1 %vm2519_vm0, %v2518_v54 }
 0x249   :  { %2053 = vmatprep.subr.bf16.mxu1 %v2518_v54 }
 0x302   :  { %v1091_v5 = vpop.f32.mrb[8].mxu1 }
 0x303   :  { %v1092_v7 = vadd.f32 %v1091_v5, %v1049_v4  ;;  %v2027_v6 = vpop.f32.mrb[9].mxu1 }
 0x304   :  { %v1094_v8 = vpop.f32.mrb[10].mxu1 }
 0x305   :  { %v1095_v9 = vadd.f32 %v1094_v8, %v1049_v4  ;;  %v2028_v10 = vpop.f32.mrb[11].mxu1  ;;  %v1240_v11 = vsel %vm1239_vm4, %v1092_v7, -inf }
 0x306   :  { %1241 = vmax.xlane.f32.xlu0 %v1240_v11 }
 0x307   :  { %v1243_v12 = vsel %vm1239_vm4, %v1095_v9, -inf }
 0x308   :  { %1244 = vmax.xlane.f32.xlu1 %v1243_v12 }
 0x30a   :  { %v1138_v13 = vpop.f32.mrb[12].mxu1 }
 0x30b   :  { %v1139_v14 = vadd.f32 %v1138_v13, %v1049_v4  ;;  %v2033_v15 = vpop.f32.mrb[13].mxu1 }
 0x30c   :  { %v1141_v16 = vpop.f32.mrb[14].mxu1 }
 0x30d   :  { %v1142_v17 = vadd.f32 %v1141_v16, %v1049_v4  ;;  %v2034_v18 = vpop.f32.mrb[15].mxu1  ;;  %v1246_v19 = vsel %vm1239_vm4, %v1139_v14, -inf }
 0x30e   :  { %1247 = vmax.xlane.f32.xlu0 %v1246_v19 }
 0x30f   :  { %v1249_v20 = vsel %vm1239_vm4, %v1142_v17, -inf }
 0x312   :  { %1250 = vmax.xlane.f32.xlu0 %v1249_v20  ;;  %v1185_v21 = vpop.f32.mrb[16].mxu1 }
 0x313   :  { %v1186_v22 = vadd.f32 %v1185_v21, %v1049_v4  ;;  %v2039_v23 = vpop.f32.mrb[17].mxu1 }
 0x314   :  { %v1188_v24 = vpop.f32.mrb[18].mxu1 }
 0x315   :  { %v1189_v25 = vadd.f32 %v1188_v24, %v1049_v4  ;;  %v2040_v26 = vpop.f32.mrb[19].mxu1  ;;  %v1252_v27 = vsel %vm1239_vm4, %v1186_v22, -inf }
 0x316   :  { %1253 = vmax.xlane.f32.xlu1 %v1252_v27 }
 0x317   :  { %v1255_v28 = vsel %vm1239_vm4, %v1189_v25, -inf }
 0x318   :  { %1256 = vmax.xlane.f32.xlu0 %v1255_v28 }
 0x31a   :  { %v1232_v29 = vpop.f32.mrb[20].mxu1 }
 0x31b   :  { %v1233_v30 = vadd.f32 %v1232_v29, %v1049_v4  ;;  %v2045_v31 = vpop.f32.mrb[21].mxu1 }
 0x31c   :  { %v1235_v32 = vpop.f32.mrb[22].mxu1 }
 0x31d   :  { %v1236_v33 = vadd.f32 %v1235_v32, %v1049_v4  ;;  %v2046_v34 = vpop.f32.mrb[23].mxu1  ;;  %v1258_v35 = vsel %vm1239_vm4, %v1233_v30, -inf }
 0x31e   :  { %1259 = vmax.xlane.f32.xlu1 %v1258_v35 }
 0x31f   :  { %v1261_v36 = vsel %vm1239_vm4, %v1236_v33, -inf }
 0x320   :  { %1262 = vmax.xlane.f32.xlu0 %v1261_v36 }
 0x393   :  { %v1242_v37 = vpop.xlane.xlu0 %1241 }
 0x394   :  { %v1264_v38 = vsub.f32 %v1092_v7, %v1242_v37  ;;  %v1312_v16 = vsub.f32 0.0, %v1242_v37 }
 0x395   :  { %v1245_v40 = vpop.xlane.xlu1 %1244 }
 0x396   :  { %v1272_v41 = vmul.f32 1.442695, %v1264_v38  ;;  %v1265_v43 = vsub.f32 %v1095_v9, %v1245_v40  ;;  %v1320_v18 = vmul.f32 1.442695, %v1312_v16 }
 0x398   :  { %2317 = vpow2.f32 %v1272_v41  ;;  %v1274_v44 = vmul.f32 1.442695, %v1265_v43 }
 0x39a   :  { %2319 = vpow2.f32 %v1274_v44 }
 0x39b   :  { %v1248_v45 = vpop.xlane.xlu0 %1247 }
 0x39c   :  { %v1266_v46 = vsub.f32 %v1139_v14, %v1248_v45  ;;  %v1314_v20 = vsub.f32 0.0, %v1248_v45 }
 0x39e   :  { %v1276_v47 = vmul.f32 1.442695, %v1266_v46  ;;  %v1324_v21 = vmul.f32 1.442695, %v1314_v20 }
 0x39f   :  { %v1251_v48 = vpop.xlane.xlu0 %1250 }
 0x3a0   :  { %2321 = vpow2.f32 %v1276_v47  ;;  %v1267_v49 = vsub.f32 %v1142_v17, %v1251_v48  ;;  %v1313_v17 = vsub.f32 0.0, %v1245_v40 }
 0x3a2   :  { %v2675_v50 = vpop.eup %2317  ;;  %v1278_v51 = vmul.f32 1.442695, %v1267_v49  ;;  %v1322_v19 = vmul.f32 1.442695, %v1313_v17 }
 0x3a3   :  { %v1254_v52 = vpop.xlane.xlu1 %1253  ;;  %v1288_v53 = vsel %vm1239_vm4, %v2675_v50, 0.0 }
 0x3a4   :  { %v2679_v55 = vpop.eup %2319  ;;  %2323 = vpow2.f32 %v1278_v51  ;;  %v1268_v56 = vsub.f32 %v1186_v22, %v1254_v52  ;;  %1289 = vadd.xlane.f32.xlu1 %v1288_v53  ;;  %v1315_v22 = vsub.f32 0.0, %v1251_v48  ;;  %v1316_v24 = vsub.f32 0.0, %v1254_v52 }
 0x3a5   :  { %v1257_v57 = vpop.xlane.xlu0 %1256  ;;  %v1291_v58 = vsel %vm1239_vm4, %v2679_v55, 0.0 }
 0x3a6   :  { %v1280_v59 = vmul.f32 1.442695, %v1268_v56  ;;  %v1269_v60 = vsub.f32 %v1189_v25, %v1257_v57  ;;  %1292 = vadd.xlane.f32.xlu0 %v1291_v58  ;;  %v1326_v23 = vmul.f32 1.442695, %v1315_v22  ;;  %v1317_v26 = vsub.f32 0.0, %v1257_v57 }
 0x3a7   :  { %v1328_v29 = vmul.f32 1.442695, %v1316_v24  ;;  %v2271_v24 = vld [vmem:[#allocation7 + $0x4] ss:$8 sps:$4 sm:$0xff]  }
 0x3a8   :  { %2325 = vpow2.f32 %v1280_v59  ;;  %v1282_v61 = vmul.f32 1.442695, %v1269_v60  ;;  %v1330_v32 = vmul.f32 1.442695, %v1317_v26  ;;  %1767 = vmatprep.subr.bf16.mxu0 %v2271_v24  ;;  %v2272_v26 = vld [vmem:[#allocation7 + $0x10] ss:$8 sps:$4 sm:$0xff]  }
 0x3aa   :  { %v2683_v62 = vpop.eup %2321  ;;  %2327 = vpow2.f32 %v1282_v61 }
 0x3ab   :  { %v2685_v63 = vpop.xlane.xlu1 %1259  ;;  %v1294_v0 = vsel %vm1239_vm4, %v2683_v62, 0.0 }
 0x3ac   :  { %v1270_v1 = vsub.f32 %v1233_v30, %v2685_v63  ;;  %1295 = vadd.xlane.f32.xlu1 %v1294_v0  ;;  %v1318_v37 = vsub.f32 0.0, %v2685_v63 }
 0x3ad   :  { %v1263_v2 = vpop.xlane.xlu0 %1262 }
 0x3ae   :  { %v2690_v3 = vpop.eup %2323  ;;  %v1284_v4 = vmul.f32 1.442695, %v1270_v1  ;;  %v1271_v5 = vsub.f32 %v1236_v33, %v1263_v2  ;;  %v1319_v35 = vsub.f32 0.0, %v1263_v2  ;;  %v1332_v45 = vmul.f32 1.442695, %v1318_v37 }
 0x3af   :  { %v1297_v7 = vsel %vm1239_vm4, %v2690_v3, 0.0  ;;  %v2298_v37 = vld [vmem:[#allocation7 + $0x94] ss:$8 sps:$4 sm:$0xff]  }
 0x3b0   :  { %2329 = vpow2.f32 %v1284_v4  ;;  %v1286_v6 = vmul.f32 1.442695, %v1271_v5  ;;  %1298 = vadd.xlane.f32.xlu0 %v1297_v7  ;;  %v1334_v43 = vmul.f32 1.442695, %v1319_v35  ;;  %v2295_v35 = vld [vmem:[#allocation7 + $0x84] ss:$8 sps:$4 sm:$0xff]  }
 0x3b2   :  { %v2694_v8 = vpop.eup %2325  ;;  %2331 = vpow2.f32 %v1286_v6 }
 0x3b3   :  { %v1300_v9 = vsel %vm1239_vm4, %v2694_v8, 0.0  ;;  %2333 = vpow2.f32 %v1320_v18 }
 0x3b4   :  { %v2698_v10 = vpop.eup %2327  ;;  %1301 = vadd.xlane.f32.xlu1 %v1300_v9  ;;  %2335 = vpow2.f32 %v1322_v19 }
 0x3b5   :  { %v1303_v11 = vsel %vm1239_vm4, %v2698_v10, 0.0  ;;  %2337 = vpow2.f32 %v1324_v21 }
 0x3b6   :  { %1304 = vadd.xlane.f32.xlu0 %v1303_v11  ;;  %2339 = vpow2.f32 %v1326_v23  ;;  %v2269_v23 = vld [vmem:[#allocation7] ss:$8 sps:$4 sm:$0xff]  }
 0x3b7   :  { %1768 = vmatpush1.bf16.msra.mxu0 %v2269_v23 }
 0x3ba   :  { %v2702_v12 = vpop.eup %2329 }
 0x3bb   :  { %v1306_v13 = vsel %vm1239_vm4, %v2702_v12, 0.0 }
 0x3bc   :  { %v2706_v14 = vpop.eup %2331  ;;  %1307 = vadd.xlane.f32.xlu1 %v1306_v13  ;;  %v1042_v13 = vpack.c.bf16 %v2642_v42, %v2642_v42 }
 0x3bd   :  { %v1309_v15 = vsel %vm1239_vm4, %v2706_v14, 0.0  ;;  %v2334_v25 = vpop.eup %2333 }
 0x3be   :  { %1310 = vadd.xlane.f32.xlu0 %v1309_v15  ;;  %v1463_v17 = vsel %vm1367_vm2, %v1042_v13, 0 }
 0x3cd   :  { %1033 = vrot.lane.b32.xlu1 %v2640_v39, %s2520_s4  ;;  %v2336_v39 = vpop.eup %2335 }
 0x3ce   :  { %v2338_v33 = vpop.eup %2337 }
 0x3cf   :  { %v2340_v38 = vpop.eup %2339 }
 0x3d4   :  { %1037 = vrot.lane.b32.xlu0 %v2642_v42, %s2520_s4 }
 0x431   :  { %v1290_v27 = vpop.xlane.xlu1 %1289 }
 0x432   :  { %v1336_v28 = vadd.f32 %v2334_v25, %v1290_v27  ;;  %v2274_v25 = vld [vmem:[#allocation7 + $0x14] ss:$8 sps:$4 sm:$0xff]   ;;  %v2277_v27 = vld [vmem:[#allocation7 + $0x24] ss:$8 sps:$4 sm:$0xff]  }
 0x433   :  { %v1293_v30 = vpop.xlane.xlu0 %1292  ;;  %1769 = vmatprep.subr.bf16.mxu0 %v2274_v25 }
 0x434   :  { %2341 = vrcp.f32 %v1336_v28  ;;  %v1337_v31 = vadd.f32 %v2336_v39, %v1293_v30  ;;  %1770 = vmatpush1.bf16.msra.mxu0 %v2272_v26  ;;  %v2275_v28 = vld [vmem:[#allocation7 + $0x20] ss:$8 sps:$4 sm:$0xff]   ;;  %v2280_v39 = vld [vmem:[#allocation7 + $0x34] ss:$8 sps:$4 sm:$0xff]   ;;  %v2284_v30 = vld [vmem:[#allocation7 + $0x50] ss:$8 sps:$4 sm:$0xff]  }
 0x435   :  { %1771 = vmatprep.subr.bf16.mxu0 %v2277_v27 }
 0x436   :  { %2343 = vrcp.f32 %v1337_v31  ;;  %v2289_v31 = vld [vmem:[#allocation7 + $0x64] ss:$8 sps:$4 sm:$0xff]  }
 0x437   :  { %2345 = vpow2.f32 %v1328_v29  ;;  %v2286_v29 = vld [vmem:[#allocation7 + $0x54] ss:$8 sps:$4 sm:$0xff]  }
 0x438   :  { %2347 = vpow2.f32 %v1330_v32  ;;  %1772 = vmatpush1.bf16.msra.mxu0 %v2275_v28  ;;  %v2287_v32 = vld [vmem:[#allocation7 + $0x60] ss:$8 sps:$4 sm:$0xff]  }
 0x439   :  { %v1296_v34 = vpop.xlane.xlu1 %1295  ;;  %1773 = vmatprep.subr.bf16.mxu0 %v2280_v39 }
 0x43a   :  { %v1338_v36 = vadd.f32 %v2338_v33, %v1296_v34  ;;  %v2292_v33 = vld [vmem:[#allocation7 + $0x74] ss:$8 sps:$4 sm:$0xff]   ;;  %v2290_v34 = vld [vmem:[#allocation7 + $0x70] ss:$8 sps:$4 sm:$0xff]  }
 0x43c   :  { %2349 = vrcp.f32 %v1338_v36  ;;  %v2293_v36 = vld [vmem:[#allocation7 + $0x80] ss:$8 sps:$4 sm:$0xff]  }
 0x43d   :  { %v1299_v40 = vpop.xlane.xlu0 %1298 }
 0x43e   :  { %v2342_v41 = vpop.eup %2341  ;;  %v1339_v44 = vadd.f32 %v2340_v38, %v1299_v40  ;;  %v2296_v38 = vld [vmem:[#allocation7 + $0x90] ss:$8 sps:$4 sm:$0xff]   ;;  %v2301_v40 = vld [vmem:[#allocation7 + $0xa4] ss:$8 sps:$4 sm:$0xff]  }
 0x43f   :  { %v1352_v48 = vmul.f32 %v2342_v41, %v2675_v50  ;;  %v2299_v41 = vld [vmem:[#allocation7 + $0xa0] ss:$8 sps:$4 sm:$0xff]  }
 0x440   :  { %v2344_v46 = vpop.eup %2343  ;;  %2351 = vrcp.f32 %v1339_v44  ;;  %v2302_v44 = vld [vmem:[#allocation7 + $0xb0] ss:$8 sps:$4 sm:$0xff]  }
 0x441   :  { %v2346_v47 = vpop.eup %2345  ;;  %v1353_v49 = vmul.f32 %v2344_v46, %v2679_v55  ;;  %v1302_v51 = vpop.xlane.xlu1 %1301  ;;  %2353 = vpow2.f32 %v1334_v43  ;;  %v2304_v43 = vld [vmem:[#allocation7 + $0xb4] ss:$8 sps:$4 sm:$0xff]   ;;  %v2305_v46 = vld [vmem:[#allocation7 + $0xc0] ss:$8 sps:$4 sm:$0xff]  }
 0x442   :  { %v1340_v52 = vadd.f32 %v2346_v47, %v1302_v51  ;;  %v2348_v53 = vpop.eup %2347  ;;  %2355 = vpow2.f32 %v1332_v45  ;;  %v2307_v45 = vld [vmem:[#allocation7 + $0xc4] ss:$8 sps:$4 sm:$0xff]   ;;  %v2310_v47 = vld [vmem:[#allocation7 + $0xd4] ss:$8 sps:$4 sm:$0xff]  }
 0x443   :  { %v1305_v56 = vpop.xlane.xlu0 %1304  ;;  %v1360_v57 = vpack.c.bf16 %v1353_v49, %v1352_v48  ;;  %v2308_v48 = vld [vmem:[#allocation7 + $0xd0] ss:$8 sps:$4 sm:$0xff]  }
 0x444   :  { %2357 = vrcp.f32 %v1340_v52  ;;  %v1341_v58 = vadd.f32 %v2348_v53, %v1305_v56 }
 0x445   :  { %2050 = vmatmul.mubr.msk.bf16.vlgmr.msra.gmra.mrb[24].mxu1 %vm1239_vm4, %v1360_v57 }
 0x446   :  { %2359 = vrcp.f32 %v1341_v58  ;;  %2055 = vmatprep.mubr.msk.bf16.mxu1 %vm2519_vm0, %v2518_v54  ;;  %v2350_v59 = vpop.eup %2349 }
 0x447   :  { %v1354_v55 = vmul.f32 %v2350_v59, %v2683_v62 }
 0x449   :  { %v1308_v60 = vpop.xlane.xlu1 %1307 }
 0x44a   :  { %v2352_v50 = vpop.eup %2351 }
 0x44b   :  { %v1355_v61 = vmul.f32 %v2352_v50, %v2690_v3  ;;  %v1311_v63 = vpop.xlane.xlu0 %1310  ;;  %v2354_v0 = vpop.eup %2353  ;;  %v2311_v50 = vld [vmem:[#allocation7 + $0xe0] ss:$8 sps:$4 sm:$0xff]  }
 0x44c   :  { %v2356_v1 = vpop.eup %2355  ;;  %v1343_v2 = vadd.f32 %v2354_v0, %v1311_v63 }
 0x44d   :  { %v1034_v4 = vpop.permute.xlu1 %1033  ;;  %v1361_v5 = vpack.c.bf16 %v1355_v61, %v1354_v55  ;;  %v1342_v9 = vadd.f32 %v2356_v1, %v1308_v60  ;;  %v2313_v55 = vld [vmem:[#allocation7 + $0xe4] ss:$8 sps:$4 sm:$0xff]  }
 0x44e   :  { %v2358_v7 = vpop.eup %2357  ;;  %v1041_v6 = vpack.c.bf16 %v1034_v4, %v1034_v4  ;;  %2361 = vrcp.f32 %v1343_v2  ;;  %v2316_v2 = vld [vmem:[#allocation7 + $0xf4] ss:$8 sps:$4 sm:$0xff]   ;;  %v2314_v4 = vld [vmem:[#allocation7 + $0xf0] ss:$8 sps:$4 sm:$0xff]  }
 0x44f   :  { %v1356_v16 = vmul.f32 %v2358_v7, %v2694_v8  ;;  %2363 = vrcp.f32 %v1342_v9  ;;  %v1038_v18 = vpop.permute.xlu0 %1037 }
 0x450   :  { %v2360_v11 = vpop.eup %2359  ;;  %v1416_v15 = vsel %vm1367_vm2, %v1041_v6, 0  ;;  %v1043_v42 = vpack.c.bf16 %v1038_v18, %v1038_v18 }
 0x451   :  { %v1357_v62 = vmul.f32 %v2360_v11, %v2698_v10  ;;  %2054 = vmatpush3.bf16.msra.mxu1 %v1416_v15 }
 0x452   :  { %2059 = vmatprep.subr.bf16.mxu1 %v2518_v54  ;;  %v1510_v10 = vsel %vm1367_vm2, %v1043_v42, 0 }
 0x453   :  { %v1362_v3 = vpack.c.bf16 %v1357_v62, %v1356_v16 }
 0x454   :  { %2056 = vmatmul.mubr.msk.bf16.vlgmr.msra.gmra.mrb[28].mxu1 %vm1239_vm4, %v1361_v5 }
 0x455   :  { %2060 = vmatpush3.bf16.msra.mxu1 %v1463_v17  ;;  %2061 = vmatprep.mubr.msk.bf16.mxu1 %vm2519_vm0, %v2518_v54 }
 0x456   :  { %2065 = vmatprep.subr.bf16.mxu1 %v2518_v54 }
 0x458   :  { %v2362_v8 = vpop.eup %2361 }
 0x459   :  { %v2364_v19 = vpop.eup %2363  ;;  %v1359_v20 = vmul.f32 %v2362_v8, %v2706_v14  ;;  %v2283_v14 = vld [vmem:[#allocation7 + $0x44] ss:$8 sps:$4 sm:$0xff]  }
 0x45a   :  { %v1358_v21 = vmul.f32 %v2364_v19, %v2702_v12  ;;  %v2281_v12 = vld [vmem:[#allocation7 + $0x40] ss:$8 sps:$4 sm:$0xff]  }
 0x45c   :  { %2062 = vmatmul.mubr.msk.bf16.vlgmr.msra.gmra.mrb[32].mxu1 %vm1239_vm4, %v1362_v3  ;;  %v1363_v22 = vpack.c.bf16 %v1359_v20, %v1358_v21 }
 0x45d   :  { %2066 = vmatpush3.bf16.msra.mxu1 %v1510_v10  ;;  %2067 = vmatprep.mubr.msk.bf16.mxu1 %vm2519_vm0, %v2518_v54  ;;  %v2278_v54 = vld [vmem:[#allocation7 + $0x30] ss:$8 sps:$4 sm:$0xff]  }
 0x45e   :  { %1774 = vmatpush1.bf16.msra.mxu0 %v2278_v54 }
 0x45f   :  { %1775 = vmatprep.subr.bf16.mxu0 %v2283_v14 }
 0x462   :  { %1776 = vmatpush1.bf16.msra.mxu0 %v2281_v12 }
 0x463   :  { %1777 = vmatprep.subr.bf16.mxu0 %v2286_v29 }
 0x464   :  { %2068 = vmatmul.mubr.msk.bf16.vlgmr.msra.gmra.mrb[36].mxu1 %vm1239_vm4, %v1363_v22 }
 0x466   :  { %1778 = vmatpush1.bf16.msra.mxu0 %v2284_v30 }
 0x467   :  { %1779 = vmatprep.subr.bf16.mxu0 %v2289_v31 }
 0x46a   :  { %1780 = vmatpush1.bf16.msra.mxu0 %v2287_v32 }
 0x46b   :  { %1781 = vmatprep.subr.bf16.mxu0 %v2292_v33 }
 0x46e   :  { %1782 = vmatpush1.bf16.msra.mxu0 %v2290_v34 }
 0x46f   :  { %1783 = vmatprep.subr.bf16.mxu0 %v2295_v35 }
 0x472   :  { %1784 = vmatpush1.bf16.msra.mxu0 %v2293_v36 }
 0x473   :  { %1785 = vmatprep.subr.bf16.mxu0 %v2298_v37 }
 0x476   :  { %1786 = vmatpush1.bf16.msra.mxu0 %v2296_v38 }
 0x477   :  { %1787 = vmatprep.subr.bf16.mxu0 %v2301_v40 }
 0x47a   :  { %1788 = vmatpush1.bf16.msra.mxu0 %v2299_v41 }
 0x47b   :  { %1789 = vmatprep.subr.bf16.mxu0 %v2304_v43 }
 0x47e   :  { %1790 = vmatpush1.bf16.msra.mxu0 %v2302_v44 }
 0x47f   :  { %1791 = vmatprep.subr.bf16.mxu0 %v2307_v45 }
 0x482   :  { %1792 = vmatpush1.bf16.msra.mxu0 %v2305_v46 }
 0x483   :  { %1793 = vmatprep.subr.bf16.mxu0 %v2310_v47 }
 0x486   :  { %1794 = vmatpush1.bf16.msra.mxu0 %v2308_v48 }
 0x487   :  { %1795 = vmatprep.subr.bf16.mxu0 %v2313_v55 }
 0x48a   :  { %1796 = vmatpush1.bf16.msra.mxu0 %v2311_v50 }
 0x48b   :  { %1797 = vmatprep.subr.bf16.mxu0 %v2316_v2 }
 0x48e   :  { %1798 = vmatpush1.bf16.msra.mxu0 %v2314_v4 }
 0x518   :  { %v1405_v49 = vpop.f32.mrb[24].mxu1 }
 0x519   :  { %v2051_v51 = vpop.f32.mrb[25].mxu1 }
 0x51a   :  { %v1408_v52 = vpop.f32.mrb[26].mxu1 }
 0x51b   :  { %v2052_v53 = vpop.f32.mrb[27].mxu1 }
 0x527   :  { %v1452_v56 = vpop.f32.mrb[28].mxu1 }
 0x528   :  { %v2057_v57 = vpop.f32.mrb[29].mxu1 }
 0x529   :  { %v1455_v58 = vpop.f32.mrb[30].mxu1 }
 0x52a   :  { %v2058_v59 = vpop.f32.mrb[31].mxu1 }
 0x52f   :  { %v1499_v60 = vpop.f32.mrb[32].mxu1 }
 0x530   :  { %v2063_v61 = vpop.f32.mrb[33].mxu1 }
 0x531   :  { %v1502_v63 = vpop.f32.mrb[34].mxu1 }
 0x532   :  { %v2104_v0 = vpack.i.bf16 %v1502_v63, %v1408_v52  ;;  %v2064_v1 = vpop.f32.mrb[35].mxu1 }
 0x537   :  { %v1546_v5 = vpop.f32.mrb[36].mxu1 }
 0x538   :  { %v2069_v7 = vpop.f32.mrb[37].mxu1 }
 0x539   :  { %v1549_v6 = vpop.f32.mrb[38].mxu1 }
 0x53a   :  { %v2099_v9 = vpack.i.bf16 %v1549_v6, %v1455_v58  ;;  %v2070_v11 = vpop.f32.mrb[39].mxu1 }
 0x53c   :  { %2100 = vrot.lane.b32.xlu1 %v2099_v9, %s2520_s4 }
 0x540   :  { %2105 = vrot.lane.b32.xlu1 %v2104_v0, %s2520_s4 }
 0x5ae   :  { %v2101_v13 = vpop.permute.xlu1 %2100 }
 0x5af   :  { %v2103_v15 = vunpack.i.h.bf16 %v2101_v13  ;;  %v2102_v16 = vunpack.i.l.bf16 %v2101_v13 }
 0x5b1   :  { %v1562_v62 = vsel %vm1050_vm1, %v1452_v56, %v2102_v16  ;;  %v1572_v3 = vsel %vm1050_vm1, %v1546_v5, %v2103_v15 }
 0x5b2   :  { %v2106_v17 = vpop.permute.xlu1 %2105  ;;  %v1574_v18 = vpack.c.bf16 %v1572_v3, %v1562_v62 }
 0x5b3   :  { %v2108_v42 = vunpack.i.h.bf16 %v2106_v17  ;;  %v2107_v8 = vunpack.i.l.bf16 %v2106_v17 }
 0x5b4   :  { %1799 = vmatprep.mubr.bf16.mxu0 %v1574_v18 }
 0x5b5   :  { %v1571_v10 = vsel %vm1050_vm1, %v1499_v60, %v2108_v42  ;;  %v1561_v19 = vsel %vm1050_vm1, %v1405_v49, %v2107_v8 }
 0x5b6   :  { %v1573_v20 = vpack.c.bf16 %v1571_v10, %v1561_v19 }
 0x5b8   :  { %1800 = vmatmul.mubr.bf16.vlgmr.msra.gmra.mrb[8].mxu0 %v1573_v20 }
 0x68b   :  { %v1801_v21 = vpop.f32.mrb[8].mxu0 }
 0x68c   :  { %1810 = vst [vmem:[#allocation11] sm:$0xff] %v1801_v21  ;;  %v1803_v22 = vpop.f32.mrb[9].mxu0 }
 0x68d   :  { %1811 = vst [vmem:[#allocation11 + $0x8] sm:$0xff] %v1803_v22  ;;  %v1805_v23 = vpop.f32.mrb[10].mxu0 }
 0x68e   :  { %1812 = vst [vmem:[#allocation11 + $0x10] sm:$0xff] %v1805_v23  ;;  %v1807_v24 = vpop.f32.mrb[11].mxu0 }
 0x68f   :  { %1813 = vst [vmem:[#allocation11 + $0x18] sm:$0xff] %v1807_v24 }
 0x690   :  { %2486 = shalt.err (!%p2483_p2)
}
 0x691   :  { %s2487_s12 = scalar_lea.hbm %s2766_s5, 512 }
 0x692   :  { %p2488_p3 = scmp.ne.s32.totalorder %s2766_s5, %s2487_s12  ;;  %p2491_p4 = scmp.lt.u32.totalorder %s2487_s12, %s2766_s5 }
 0x694   :  { %p2493_p5 = pnand %p2491_p4, %p2488_p3 }
 0x696   :  { %2496 = shalt.err (!%p2493_p5)
}
 0x697   :  { %1825 = dma.vmem_to_hbm [thread:$0]  %s1820_s17, 512, %s2766_s5, [#allocation4], %s2512_s3, %s2512_s3, %s2513_s30  }
 0x698   :  { %2503 = dma.done.wait [#allocation4], 512  }
 0x699   :  { %2504 = vsyncadd [#allocation4], 4294966784 }
 0x69a   :  { %1829 = vsyncpa [#allocation3], 1 }
 0x69b   :  { %1830 = vsyncpa [#allocation6], 1 }
 0x69c   :  { %1831 = vsyncpa [#allocation9], 1 }
 0x69d   :  { %1832 = vsyncpa [#allocation4], 1 }

</bundles_post_ra>
